<compile_context>
chip_gen: v6e
topology: v6e:2x2x1
jax: 0.10.0
libtpu: 0.0.40
codegen_flags: <defaults>
</compile_context>

<pallas_src>
import math
import jax
import jax.numpy as jnp
from jax.experimental import pallas as pl
from jax.experimental.pallas import tpu as pltpu

# ---- problem sizes (small, consistent with the module) ----
B, T, S, D = 2, 8, 8, 32          # batch, tgt seq, src seq, d_model
H = 4                             # nhead
HD = D // H                       # head_dim
DFF = 64                          # dim_feedforward
EPS = 1e-6                        # layer_norm_eps
MASKED = -1e20                    # mask filler (matches the module's masked_fill)
CROSS = -1e30                     # cross-batch filler (strictly below MASKED)

N = B * T                         # flattened query rows       (16)
M = B * S                         # flattened key rows         (16)
HN = H * N                        # head-expanded query rows   (64)
VW = max(D, DFF)                  # packed small-vector width  (64)
CROWS = HN + 8                    # const-slab rows            (72)
CCOLS = 128                       # const-slab lanes (lane-dense)


# ------------------------- the Pallas kernel -------------------------
def decoder_layer_kernel(x_ref, enc_ref, w_ref, const_ref, out_ref):
    x = x_ref[...]            # (N, D)
    enc = enc_ref[...]        # (M, D)
    w = w_ref[...]            # (D, 8*D + DFF) packed weights (input dim = D)
    c = const_ref[...]        # (CROWS, CCOLS) packed constants

    hmask = c[0:HN, 0:D]                          # (HN, D) head-column selector
    w_ff2 = c[0:DFF, D:2 * D]                     # (DFF, D)
    sa_bias = c[0:HN, 2 * D:2 * D + M]            # (HN, M) self-attn additive bias
    ca_bias = c[0:HN, 2 * D + M:2 * D + 2 * M]    # (HN, M) cross-attn additive bias
    ff_b1 = c[HN + 0:HN + 1, 0:DFF]
    ff_b2 = c[HN + 1:HN + 2, 0:D]
    ln0_a = c[HN + 2:HN + 3, 0:D]; ln0_b = c[HN + 3:HN + 4, 0:D]
    ln1_a = c[HN + 4:HN + 5, 0:D]; ln1_b = c[HN + 5:HN + 6, 0:D]
    ln2_a = c[HN + 6:HN + 7, 0:D]; ln2_b = c[HN + 7:HN + 8, 0:D]

    # Cross-attention K/V projection depends only on `enc`; issued first so its
    # MXU push/pop round trip hides under LN0 / self-attention VPU+EUP work.
    kv_cross = jnp.dot(enc, w[:, 5 * D:7 * D], preferred_element_type=jnp.float32)

    def layernorm(z, a, b):
        # module's custom LayerNorm: unbiased std (ddof=1), eps added to std
        mean = jnp.mean(z, axis=-1, keepdims=True)
        var = jnp.sum((z - mean) ** 2, axis=-1, keepdims=True) / (z.shape[-1] - 1)
        return a * (z - mean) / (jnp.sqrt(var) + EPS) + b

    def attention(q, k, v, bias, wo):
        # Head-expanded-QUERY formulation: row h*N+i of `qe` is query i restricted
        # to head h's feature columns (1/sqrt(HD) already folded into wq), so
        #   scores[h*N + i, j] == (q_h[i] . k_h[j]).
        # Each score row spans exactly one (head, query) pair, so the softmax max
        # and sum are plain per-row lane reductions: numerically stable per head
        # (no cross-head underflow) and no seg matmul on the serial MXU chain.
        qe = jnp.tile(q, (H, 1)) * hmask                                   # (HN, D)
        s = jax.lax.dot_general(qe, k, (((1,), (1,)), ((), ())),
                                preferred_element_type=jnp.float32)        # (HN, M)
        s = s + bias
        s = s - jnp.max(s, axis=-1, keepdims=True)       # per-(head, query) max
        e = jnp.exp(s)
        probs = e / jnp.sum(e, axis=-1, keepdims=True)   # exact divide: f32 parity
        ctx_e = jnp.dot(probs, v, preferred_element_type=jnp.float32)      # (HN, D)
        ctx_e = ctx_e * hmask                 # keep head h's columns in its rows
        ctx = ctx_e[0:N, :]
        for h in range(1, H):                 # fold heads: 3 cheap VPU adds
            ctx = ctx + ctx_e[h * N:(h + 1) * N, :]
        return jnp.dot(ctx, wo, preferred_element_type=jnp.float32)

    # ---- residual block 0: self-attention (pre-norm), fused QKV matmul ----
    nx = layernorm(x, ln0_a, ln0_b)
    qkv = jnp.dot(nx, w[:, 0:3 * D], preferred_element_type=jnp.float32)
    x = x + attention(qkv[:, 0:D], qkv[:, D:2 * D], qkv[:, 2 * D:3 * D],
                      sa_bias, w[:, 3 * D:4 * D])

    # ---- residual block 1: cross-attention (K/V precomputed at the top) ----
    nx = layernorm(x, ln1_a, ln1_b)
    q = jnp.dot(nx, w[:, 4 * D:5 * D], preferred_element_type=jnp.float32)
    x = x + attention(q, kv_cross[:, 0:D], kv_cross[:, D:2 * D],
                      ca_bias, w[:, 7 * D:8 * D])

    # ---- residual block 2: feed-forward ----
    nx = layernorm(x, ln2_a, ln2_b)
    h1 = jnp.maximum(
        jnp.dot(nx, w[:, 8 * D:8 * D + DFF], preferred_element_type=jnp.float32)
        + ff_b1, 0.0)
    x = x + jnp.dot(h1, w_ff2, preferred_element_type=jnp.float32) + ff_b2

    out_ref[...] = x          # single full-tile store at the end (v5e 1 vst slot)


# ------------------- one-time packing (NOT on the hot path) -------------------
def _expanded_bias(mask):
    """(B, Tq, Tk) 0/1 mask -> (H*B*Tq, B*Tk) additive bias for the
    head-expanded-query score matrix.  allowed -> 0, masked (same batch) ->
    MASKED (-1e20, i.e. the module's masked_fill value), cross-batch -> CROSS
    (strictly more negative so fully-masked rows still reduce to a uniform
    softmax over their own batch's keys, like the reference)."""
    Bq, Tq, Tk = mask.shape
    allowed = jnp.zeros((Bq * Tq, Bq * Tk), jnp.float32)
    for b in range(Bq):
        allowed = allowed.at[b * Tq:(b + 1) * Tq, b * Tk:(b + 1) * Tk].set(mask[b])
    qb = jnp.repeat(jnp.arange(Bq), Tq)
    kb = jnp.repeat(jnp.arange(Bq), Tk)
    same_batch = qb[:, None] == kb[None, :]
    bias = jnp.where(allowed != 0, 0.0, jnp.where(same_batch, MASKED, CROSS))
    return jnp.tile(bias.astype(jnp.float32), (H, 1))


def _pad_row(v, width):
    return jnp.pad(v, ((0, 0), (0, width - v.shape[-1])))


def prepare_decoder_layer(params, src_mask, tgt_mask):
    """Builds the two constant slabs the kernel consumes.  Runs ONCE (per set of
    weights/masks); the per-call hot path is just `decoder_layer`."""
    (sa_wq, sa_wk, sa_wv, sa_wo, ca_wq, ca_wk, ca_wv, ca_wo,
     ff_w1, ff_b1, ff_w2, ff_b2,
     ln0_a, ln0_b, ln1_a, ln1_b, ln2_a, ln2_b) = params
    scale = 1.0 / math.sqrt(HD)

    # weight slab: every weight whose input dim is D; attention scale folded into q
    w_pack = jnp.concatenate(
        [sa_wq * scale, sa_wk, sa_wv, sa_wo,
         ca_wq * scale, ca_wk, ca_wv, ca_wo, ff_w1], axis=1)       # (D, 8*D + DFF)

    # head selector: row h*N+i keeps only head h's feature columns
    row_head = jnp.repeat(jnp.arange(H), N)
    col_head = jnp.arange(D) // HD
    hmask = (row_head[:, None] == col_head[None, :]).astype(jnp.float32)  # (HN, D)

    vec = jnp.concatenate(
        [_pad_row(ff_b1, VW), _pad_row(ff_b2, VW),
         _pad_row(ln0_a, VW), _pad_row(ln0_b, VW),
         _pad_row(ln1_a, VW), _pad_row(ln1_b, VW),
         _pad_row(ln2_a, VW), _pad_row(ln2_b, VW)], axis=0)        # (8, VW)

    # lane-dense constant slab
    const = jnp.zeros((CROWS, CCOLS), jnp.float32)
    const = const.at[0:HN, 0:D].set(hmask)
    const = const.at[0:DFF, D:2 * D].set(ff_w2)
    const = const.at[0:HN, 2 * D:2 * D + M].set(_expanded_bias(tgt_mask))
    const = const.at[0:HN, 2 * D + M:2 * D + 2 * M].set(_expanded_bias(src_mask))
    const = const.at[HN:HN + 8, 0:VW].set(vec)
    return w_pack, const


# ------------------------- hot-path wrapper -------------------------
@jax.jit
def decoder_layer(x, encoder_out, w_pack, const):
    x_flat = x.reshape(N, D)
    enc_flat = encoder_out.reshape(M, D)
    vmem = pltpu.MemorySpace.VMEM
    out_flat = pl.pallas_call(
        decoder_layer_kernel,
        out_shape=jax.ShapeDtypeStruct((N, D), jnp.float32),
        in_specs=[pl.BlockSpec(memory_space=vmem)] * 4,
        out_specs=pl.BlockSpec(memory_space=vmem),
    )(x_flat, enc_flat, w_pack, const)
    return out_flat.reshape(B, T, D)


# ------------------------- pure-JAX reference -------------------------
def reference(x, enc, src_mask, tgt_mask, params):
    (sa_wq, sa_wk, sa_wv, sa_wo, ca_wq, ca_wk, ca_wv, ca_wo,
     ff_w1, ff_b1, ff_w2, ff_b2,
     ln0_a, ln0_b, ln1_a, ln1_b, ln2_a, ln2_b) = params

    def ln(z, a, b):
        mean = jnp.mean(z, -1, keepdims=True)
        var = jnp.sum((z - mean) ** 2, -1, keepdims=True) / (z.shape[-1] - 1)
        return a * (z - mean) / (jnp.sqrt(var) + EPS) + b

    def mha(qi, kvi, mask, wq, wk, wv, wo):
        Bq, Tq, _ = qi.shape
        Tk = kvi.shape[1]
        q = (qi @ wq).reshape(Bq, Tq, H, HD).transpose(0, 2, 1, 3)
        k = (kvi @ wk).reshape(Bq, Tk, H, HD).transpose(0, 2, 1, 3)
        v = (kvi @ wv).reshape(Bq, Tk, H, HD).transpose(0, 2, 1, 3)
        scores = (q @ k.transpose(0, 1, 3, 2)) / math.sqrt(HD)
        scores = jnp.where(mask[:, None, :, :] == 0, MASKED, scores)
        probs = jax.nn.softmax(scores, -1)
        o = (probs @ v).transpose(0, 2, 1, 3).reshape(Bq, Tq, D)
        return o @ wo

    xx = x
    nx = ln(xx, ln0_a, ln0_b)
    xx = xx + mha(nx, nx, tgt_mask, sa_wq, sa_wk, sa_wv, sa_wo)
    nx = ln(xx, ln1_a, ln1_b)
    xx = xx + mha(nx, enc, src_mask, ca_wq, ca_wk, ca_wv, ca_wo)
    nx = ln(xx, ln2_a, ln2_b)
    h1 = jnp.maximum(nx @ ff_w1 + ff_b1, 0.0)
    return xx + (h1 @ ff_w2 + ff_b2)


# ------------------------- main -------------------------
if __name__ == "__main__":
    key = jax.random.PRNGKey(0)
    ks = list(jax.random.split(key, 20))

    def rnd(k, shape, scale=0.05):
        return (scale * jax.random.normal(k, shape)).astype(jnp.float32)

    # deterministic synthetic parameters (shapes from the module __init__);
    # linear weights stored pre-transposed as (d_in, d_out) so kernels compute x @ W
    sa_wq, sa_wk, sa_wv, sa_wo = (rnd(ks[i], (D, D)) for i in range(4))
    ca_wq, ca_wk, ca_wv, ca_wo = (rnd(ks[4 + i], (D, D)) for i in range(4))
    ff_w1 = rnd(ks[8], (D, DFF)); ff_b1 = rnd(ks[9], (1, DFF))
    ff_w2 = rnd(ks[10], (DFF, D)); ff_b2 = rnd(ks[11], (1, D))
    ln0_a = 1.0 + rnd(ks[12], (1, D)); ln0_b = rnd(ks[13], (1, D))
    ln1_a = 1.0 + rnd(ks[14], (1, D)); ln1_b = rnd(ks[15], (1, D))
    ln2_a = 1.0 + rnd(ks[16], (1, D)); ln2_b = rnd(ks[17], (1, D))

    params = (sa_wq, sa_wk, sa_wv, sa_wo, ca_wq, ca_wk, ca_wv, ca_wo,
              ff_w1, ff_b1, ff_w2, ff_b2,
              ln0_a, ln0_b, ln1_a, ln1_b, ln2_a, ln2_b)

    x = jax.random.normal(ks[18], (B, T, D), dtype=jnp.float32)
    enc = jax.random.normal(ks[19], (B, S, D), dtype=jnp.float32)

    # causal target mask; src mask blocks the last source position
    tgt_mask = jnp.broadcast_to(jnp.tril(jnp.ones((T, T), jnp.float32)), (B, T, T))
    src_mask = jnp.ones((B, T, S), jnp.float32).at[:, :, -1].set(0.0)

    # one-time packing (NOT per call)
    w_pack, const = prepare_decoder_layer(params, src_mask, tgt_mask)

    out = decoder_layer(x, enc, w_pack, const)
    out = jax.block_until_ready(out)

    ref = reference(x, enc, src_mask, tgt_mask, params)
    assert out.shape == (B, T, D)
    assert jnp.allclose(out, ref, atol=1e-4, rtol=1e-4), "mismatch vs JAX reference"

    print("KERNEL_OK")
</pallas_src>

<mosaic_0001>
module attributes {stable_mosaic.version = 11 : i64} {
  func.func @decoder_layer_kernel(%arg0: memref<16x32xf32, #tpu.memory_space<vmem>>, %arg1: memref<16x32xf32, #tpu.memory_space<vmem>>, %arg2: memref<32x320xf32, #tpu.memory_space<vmem>>, %arg3: memref<72x128xf32, #tpu.memory_space<vmem>>, %arg4: memref<16x32xf32, #tpu.memory_space<vmem>>) attributes {dimension_semantics = [], scalar_prefetch = 0 : i64, scratch_operands = 0 : i64, tpu.core_type = #tpu.core_type<tc>} {
    %c0 = arith.constant 0 : index
    %c0_0 = arith.constant 0 : index
    %0 = vector.load %arg0[%c0, %c0_0] : memref<16x32xf32, #tpu.memory_space<vmem>>, vector<16x32xf32>
    %c0_1 = arith.constant 0 : index
    %c0_2 = arith.constant 0 : index
    %1 = vector.load %arg1[%c0_1, %c0_2] : memref<16x32xf32, #tpu.memory_space<vmem>>, vector<16x32xf32>
    %c0_3 = arith.constant 0 : index
    %c0_4 = arith.constant 0 : index
    %2 = vector.load %arg2[%c0_3, %c0_4] : memref<32x320xf32, #tpu.memory_space<vmem>>, vector<32x320xf32>
    %c0_5 = arith.constant 0 : index
    %c0_6 = arith.constant 0 : index
    %3 = vector.load %arg3[%c0_5, %c0_6] : memref<72x128xf32, #tpu.memory_space<vmem>>, vector<72x128xf32>
    %4 = vector.extract_strided_slice %3 {offsets = [0, 0], sizes = [64, 32], strides = [1, 1]} : vector<72x128xf32> to vector<64x32xf32>
    %5 = vector.extract_strided_slice %3 {offsets = [0, 32], sizes = [64, 32], strides = [1, 1]} : vector<72x128xf32> to vector<64x32xf32>
    %6 = vector.extract_strided_slice %3 {offsets = [0, 64], sizes = [64, 16], strides = [1, 1]} : vector<72x128xf32> to vector<64x16xf32>
    %7 = vector.extract_strided_slice %3 {offsets = [0, 80], sizes = [64, 16], strides = [1, 1]} : vector<72x128xf32> to vector<64x16xf32>
    %8 = vector.extract_strided_slice %3 {offsets = [64, 0], sizes = [1, 64], strides = [1, 1]} : vector<72x128xf32> to vector<1x64xf32>
    %9 = vector.extract_strided_slice %3 {offsets = [65, 0], sizes = [1, 32], strides = [1, 1]} : vector<72x128xf32> to vector<1x32xf32>
    %10 = vector.extract_strided_slice %3 {offsets = [66, 0], sizes = [1, 32], strides = [1, 1]} : vector<72x128xf32> to vector<1x32xf32>
    %11 = vector.extract_strided_slice %3 {offsets = [67, 0], sizes = [1, 32], strides = [1, 1]} : vector<72x128xf32> to vector<1x32xf32>
    %12 = vector.extract_strided_slice %3 {offsets = [68, 0], sizes = [1, 32], strides = [1, 1]} : vector<72x128xf32> to vector<1x32xf32>
    %13 = vector.extract_strided_slice %3 {offsets = [69, 0], sizes = [1, 32], strides = [1, 1]} : vector<72x128xf32> to vector<1x32xf32>
    %14 = vector.extract_strided_slice %3 {offsets = [70, 0], sizes = [1, 32], strides = [1, 1]} : vector<72x128xf32> to vector<1x32xf32>
    %15 = vector.extract_strided_slice %3 {offsets = [71, 0], sizes = [1, 32], strides = [1, 1]} : vector<72x128xf32> to vector<1x32xf32>
    %16 = vector.extract_strided_slice %2 {offsets = [0, 160], sizes = [32, 64], strides = [1, 1]} : vector<32x320xf32> to vector<32x64xf32>
    %cst = arith.constant dense<0.000000e+00> : vector<16x64xf32>
    %17 = tpu.matmul %1, %16, %cst {dimension_numbers = #tpu.dot_dimension_numbers<[1], [0], [0], [1], [0, 0, 1, 1], [], []>} : vector<16x32xf32>, vector<32x64xf32>, vector<16x64xf32> -> vector<16x64xf32>
    %cst_7 = arith.constant dense<0.000000e+00> : vector<16xf32>
    %18 = vector.multi_reduction <add>, %0, %cst_7 [1] : vector<16x32xf32> to vector<16xf32>
    %19 = vector.shape_cast %18 : vector<16xf32> to vector<16x1xf32>
    %cst_8 = arith.constant 3.200000e+01 : f32
    %20 = vector.broadcast %cst_8 : f32 to vector<16x1xf32>
    %21 = arith.divf %19, %20 : vector<16x1xf32>
    %22 = vector.broadcast %21 : vector<16x1xf32> to vector<16x32xf32>
    %23 = arith.subf %0, %22 : vector<16x32xf32>
    %24 = arith.mulf %23, %23 : vector<16x32xf32>
    %cst_9 = arith.constant dense<0.000000e+00> : vector<16xf32>
    %25 = vector.multi_reduction <add>, %24, %cst_9 [1] : vector<16x32xf32> to vector<16xf32>
    %26 = vector.shape_cast %25 : vector<16xf32> to vector<16x1xf32>
    %cst_10 = arith.constant 3.100000e+01 : f32
    %27 = vector.broadcast %cst_10 : f32 to vector<16x1xf32>
    %28 = arith.divf %26, %27 : vector<16x1xf32>
    %29 = vector.broadcast %21 : vector<16x1xf32> to vector<16x32xf32>
    %30 = arith.subf %0, %29 : vector<16x32xf32>
    %31 = vector.broadcast %10 : vector<1x32xf32> to vector<16x32xf32>
    %32 = arith.mulf %31, %30 : vector<16x32xf32>
    %33 = math.sqrt %28 : vector<16x1xf32>
    %cst_11 = arith.constant 9.99999997E-7 : f32
    %34 = vector.broadcast %cst_11 : f32 to vector<16x1xf32>
    %35 = arith.addf %33, %34 : vector<16x1xf32>
    %36 = vector.broadcast %35 : vector<16x1xf32> to vector<16x32xf32>
    %37 = arith.divf %32, %36 : vector<16x32xf32>
    %38 = vector.broadcast %11 : vector<1x32xf32> to vector<16x32xf32>
    %39 = arith.addf %37, %38 : vector<16x32xf32>
    %40 = vector.extract_strided_slice %2 {offsets = [0, 0], sizes = [32, 96], strides = [1, 1]} : vector<32x320xf32> to vector<32x96xf32>
    %cst_12 = arith.constant dense<0.000000e+00> : vector<16x96xf32>
    %41 = tpu.matmul %39, %40, %cst_12 {dimension_numbers = #tpu.dot_dimension_numbers<[1], [0], [0], [1], [0, 0, 1, 1], [], []>} : vector<16x32xf32>, vector<32x96xf32>, vector<16x96xf32> -> vector<16x96xf32>
    %42 = vector.extract_strided_slice %41 {offsets = [0, 0], sizes = [16, 32], strides = [1, 1]} : vector<16x96xf32> to vector<16x32xf32>
    %43 = vector.extract_strided_slice %41 {offsets = [0, 32], sizes = [16, 32], strides = [1, 1]} : vector<16x96xf32> to vector<16x32xf32>
    %44 = vector.extract_strided_slice %41 {offsets = [0, 64], sizes = [16, 32], strides = [1, 1]} : vector<16x96xf32> to vector<16x32xf32>
    %45 = vector.extract_strided_slice %2 {offsets = [0, 96], sizes = [32, 32], strides = [1, 1]} : vector<32x320xf32> to vector<32x32xf32>
    %46 = tpu.concatenate %42, %42, %42, %42 in 0 : vector<16x32xf32>, vector<16x32xf32>, vector<16x32xf32>, vector<16x32xf32> -> vector<64x32xf32>
    %47 = arith.mulf %46, %4 : vector<64x32xf32>
    %cst_13 = arith.constant dense<0.000000e+00> : vector<64x16xf32>
    %48 = tpu.matmul %47, %43, %cst_13 {dimension_numbers = #tpu.dot_dimension_numbers<[1], [1], [0], [0], [0, 0, 1, 0], [], []>} : vector<64x32xf32>, vector<16x32xf32>, vector<64x16xf32> -> vector<64x16xf32>
    %49 = arith.addf %48, %6 : vector<64x16xf32>
    %cst_14 = arith.constant dense<0xFF800000> : vector<64xf32>
    %50 = vector.multi_reduction <maximumf>, %49, %cst_14 [1] : vector<64x16xf32> to vector<64xf32>
    %51 = vector.shape_cast %50 : vector<64xf32> to vector<64x1xf32>
    %52 = vector.broadcast %51 : vector<64x1xf32> to vector<64x16xf32>
    %53 = arith.subf %49, %52 : vector<64x16xf32>
    %54 = math.exp %53 : vector<64x16xf32>
    %cst_15 = arith.constant dense<0.000000e+00> : vector<64xf32>
    %55 = vector.multi_reduction <add>, %54, %cst_15 [1] : vector<64x16xf32> to vector<64xf32>
    %56 = vector.shape_cast %55 : vector<64xf32> to vector<64x1xf32>
    %57 = vector.broadcast %56 : vector<64x1xf32> to vector<64x16xf32>
    %58 = arith.divf %54, %57 : vector<64x16xf32>
    %cst_16 = arith.constant dense<0.000000e+00> : vector<64x32xf32>
    %59 = tpu.matmul %58, %44, %cst_16 {dimension_numbers = #tpu.dot_dimension_numbers<[1], [0], [0], [1], [0, 0, 1, 1], [], []>} : vector<64x16xf32>, vector<16x32xf32>, vector<64x32xf32> -> vector<64x32xf32>
    %60 = arith.mulf %59, %4 : vector<64x32xf32>
    %61 = vector.extract_strided_slice %60 {offsets = [0, 0], sizes = [16, 32], strides = [1, 1]} : vector<64x32xf32> to vector<16x32xf32>
    %62 = vector.extract_strided_slice %60 {offsets = [16, 0], sizes = [16, 32], strides = [1, 1]} : vector<64x32xf32> to vector<16x32xf32>
    %63 = arith.addf %61, %62 : vector<16x32xf32>
    %64 = vector.extract_strided_slice %60 {offsets = [32, 0], sizes = [16, 32], strides = [1, 1]} : vector<64x32xf32> to vector<16x32xf32>
    %65 = arith.addf %63, %64 : vector<16x32xf32>
    %66 = vector.extract_strided_slice %60 {offsets = [48, 0], sizes = [16, 32], strides = [1, 1]} : vector<64x32xf32> to vector<16x32xf32>
    %67 = arith.addf %65, %66 : vector<16x32xf32>
    %cst_17 = arith.constant dense<0.000000e+00> : vector<16x32xf32>
    %68 = tpu.matmul %67, %45, %cst_17 {dimension_numbers = #tpu.dot_dimension_numbers<[1], [0], [0], [1], [0, 0, 1, 1], [], []>} : vector<16x32xf32>, vector<32x32xf32>, vector<16x32xf32> -> vector<16x32xf32>
    %69 = arith.addf %0, %68 : vector<16x32xf32>
    %cst_18 = arith.constant dense<0.000000e+00> : vector<16xf32>
    %70 = vector.multi_reduction <add>, %69, %cst_18 [1] : vector<16x32xf32> to vector<16xf32>
    %71 = vector.shape_cast %70 : vector<16xf32> to vector<16x1xf32>
    %cst_19 = arith.constant 3.200000e+01 : f32
    %72 = vector.broadcast %cst_19 : f32 to vector<16x1xf32>
    %73 = arith.divf %71, %72 : vector<16x1xf32>
    %74 = vector.broadcast %73 : vector<16x1xf32> to vector<16x32xf32>
    %75 = arith.subf %69, %74 : vector<16x32xf32>
    %76 = arith.mulf %75, %75 : vector<16x32xf32>
    %cst_20 = arith.constant dense<0.000000e+00> : vector<16xf32>
    %77 = vector.multi_reduction <add>, %76, %cst_20 [1] : vector<16x32xf32> to vector<16xf32>
    %78 = vector.shape_cast %77 : vector<16xf32> to vector<16x1xf32>
    %cst_21 = arith.constant 3.100000e+01 : f32
    %79 = vector.broadcast %cst_21 : f32 to vector<16x1xf32>
    %80 = arith.divf %78, %79 : vector<16x1xf32>
    %81 = vector.broadcast %73 : vector<16x1xf32> to vector<16x32xf32>
    %82 = arith.subf %69, %81 : vector<16x32xf32>
    %83 = vector.broadcast %12 : vector<1x32xf32> to vector<16x32xf32>
    %84 = arith.mulf %83, %82 : vector<16x32xf32>
    %85 = math.sqrt %80 : vector<16x1xf32>
    %cst_22 = arith.constant 9.99999997E-7 : f32
    %86 = vector.broadcast %cst_22 : f32 to vector<16x1xf32>
    %87 = arith.addf %85, %86 : vector<16x1xf32>
    %88 = vector.broadcast %87 : vector<16x1xf32> to vector<16x32xf32>
    %89 = arith.divf %84, %88 : vector<16x32xf32>
    %90 = vector.broadcast %13 : vector<1x32xf32> to vector<16x32xf32>
    %91 = arith.addf %89, %90 : vector<16x32xf32>
    %92 = vector.extract_strided_slice %2 {offsets = [0, 128], sizes = [32, 32], strides = [1, 1]} : vector<32x320xf32> to vector<32x32xf32>
    %cst_23 = arith.constant dense<0.000000e+00> : vector<16x32xf32>
    %93 = tpu.matmul %91, %92, %cst_23 {dimension_numbers = #tpu.dot_dimension_numbers<[1], [0], [0], [1], [0, 0, 1, 1], [], []>} : vector<16x32xf32>, vector<32x32xf32>, vector<16x32xf32> -> vector<16x32xf32>
    %94 = vector.extract_strided_slice %17 {offsets = [0, 0], sizes = [16, 32], strides = [1, 1]} : vector<16x64xf32> to vector<16x32xf32>
    %95 = vector.extract_strided_slice %17 {offsets = [0, 32], sizes = [16, 32], strides = [1, 1]} : vector<16x64xf32> to vector<16x32xf32>
    %96 = vector.extract_strided_slice %2 {offsets = [0, 224], sizes = [32, 32], strides = [1, 1]} : vector<32x320xf32> to vector<32x32xf32>
    %97 = tpu.concatenate %93, %93, %93, %93 in 0 : vector<16x32xf32>, vector<16x32xf32>, vector<16x32xf32>, vector<16x32xf32> -> vector<64x32xf32>
    %98 = arith.mulf %97, %4 : vector<64x32xf32>
    %cst_24 = arith.constant dense<0.000000e+00> : vector<64x16xf32>
    %99 = tpu.matmul %98, %94, %cst_24 {dimension_numbers = #tpu.dot_dimension_numbers<[1], [1], [0], [0], [0, 0, 1, 0], [], []>} : vector<64x32xf32>, vector<16x32xf32>, vector<64x16xf32> -> vector<64x16xf32>
    %100 = arith.addf %99, %7 : vector<64x16xf32>
    %cst_25 = arith.constant dense<0xFF800000> : vector<64xf32>
    %101 = vector.multi_reduction <maximumf>, %100, %cst_25 [1] : vector<64x16xf32> to vector<64xf32>
    %102 = vector.shape_cast %101 : vector<64xf32> to vector<64x1xf32>
    %103 = vector.broadcast %102 : vector<64x1xf32> to vector<64x16xf32>
    %104 = arith.subf %100, %103 : vector<64x16xf32>
    %105 = math.exp %104 : vector<64x16xf32>
    %cst_26 = arith.constant dense<0.000000e+00> : vector<64xf32>
    %106 = vector.multi_reduction <add>, %105, %cst_26 [1] : vector<64x16xf32> to vector<64xf32>
    %107 = vector.shape_cast %106 : vector<64xf32> to vector<64x1xf32>
    %108 = vector.broadcast %107 : vector<64x1xf32> to vector<64x16xf32>
    %109 = arith.divf %105, %108 : vector<64x16xf32>
    %cst_27 = arith.constant dense<0.000000e+00> : vector<64x32xf32>
    %110 = tpu.matmul %109, %95, %cst_27 {dimension_numbers = #tpu.dot_dimension_numbers<[1], [0], [0], [1], [0, 0, 1, 1], [], []>} : vector<64x16xf32>, vector<16x32xf32>, vector<64x32xf32> -> vector<64x32xf32>
    %111 = arith.mulf %110, %4 : vector<64x32xf32>
    %112 = vector.extract_strided_slice %111 {offsets = [0, 0], sizes = [16, 32], strides = [1, 1]} : vector<64x32xf32> to vector<16x32xf32>
    %113 = vector.extract_strided_slice %111 {offsets = [16, 0], sizes = [16, 32], strides = [1, 1]} : vector<64x32xf32> to vector<16x32xf32>
    %114 = arith.addf %112, %113 : vector<16x32xf32>
    %115 = vector.extract_strided_slice %111 {offsets = [32, 0], sizes = [16, 32], strides = [1, 1]} : vector<64x32xf32> to vector<16x32xf32>
    %116 = arith.addf %114, %115 : vector<16x32xf32>
    %117 = vector.extract_strided_slice %111 {offsets = [48, 0], sizes = [16, 32], strides = [1, 1]} : vector<64x32xf32> to vector<16x32xf32>
    %118 = arith.addf %116, %117 : vector<16x32xf32>
    %cst_28 = arith.constant dense<0.000000e+00> : vector<16x32xf32>
    %119 = tpu.matmul %118, %96, %cst_28 {dimension_numbers = #tpu.dot_dimension_numbers<[1], [0], [0], [1], [0, 0, 1, 1], [], []>} : vector<16x32xf32>, vector<32x32xf32>, vector<16x32xf32> -> vector<16x32xf32>
    %120 = arith.addf %69, %119 : vector<16x32xf32>
    %cst_29 = arith.constant dense<0.000000e+00> : vector<16xf32>
    %121 = vector.multi_reduction <add>, %120, %cst_29 [1] : vector<16x32xf32> to vector<16xf32>
    %122 = vector.shape_cast %121 : vector<16xf32> to vector<16x1xf32>
    %cst_30 = arith.constant 3.200000e+01 : f32
    %123 = vector.broadcast %cst_30 : f32 to vector<16x1xf32>
    %124 = arith.divf %122, %123 : vector<16x1xf32>
    %125 = vector.broadcast %124 : vector<16x1xf32> to vector<16x32xf32>
    %126 = arith.subf %120, %125 : vector<16x32xf32>
    %127 = arith.mulf %126, %126 : vector<16x32xf32>
    %cst_31 = arith.constant dense<0.000000e+00> : vector<16xf32>
    %128 = vector.multi_reduction <add>, %127, %cst_31 [1] : vector<16x32xf32> to vector<16xf32>
    %129 = vector.shape_cast %128 : vector<16xf32> to vector<16x1xf32>
    %cst_32 = arith.constant 3.100000e+01 : f32
    %130 = vector.broadcast %cst_32 : f32 to vector<16x1xf32>
    %131 = arith.divf %129, %130 : vector<16x1xf32>
    %132 = vector.broadcast %124 : vector<16x1xf32> to vector<16x32xf32>
    %133 = arith.subf %120, %132 : vector<16x32xf32>
    %134 = vector.broadcast %14 : vector<1x32xf32> to vector<16x32xf32>
    %135 = arith.mulf %134, %133 : vector<16x32xf32>
    %136 = math.sqrt %131 : vector<16x1xf32>
    %cst_33 = arith.constant 9.99999997E-7 : f32
    %137 = vector.broadcast %cst_33 : f32 to vector<16x1xf32>
    %138 = arith.addf %136, %137 : vector<16x1xf32>
    %139 = vector.broadcast %138 : vector<16x1xf32> to vector<16x32xf32>
    %140 = arith.divf %135, %139 : vector<16x32xf32>
    %141 = vector.broadcast %15 : vector<1x32xf32> to vector<16x32xf32>
    %142 = arith.addf %140, %141 : vector<16x32xf32>
    %143 = vector.extract_strided_slice %2 {offsets = [0, 256], sizes = [32, 64], strides = [1, 1]} : vector<32x320xf32> to vector<32x64xf32>
    %cst_34 = arith.constant dense<0.000000e+00> : vector<16x64xf32>
    %144 = tpu.matmul %142, %143, %cst_34 {dimension_numbers = #tpu.dot_dimension_numbers<[1], [0], [0], [1], [0, 0, 1, 1], [], []>} : vector<16x32xf32>, vector<32x64xf32>, vector<16x64xf32> -> vector<16x64xf32>
    %145 = vector.broadcast %8 : vector<1x64xf32> to vector<16x64xf32>
    %146 = arith.addf %144, %145 : vector<16x64xf32>
    %cst_35 = arith.constant 0.000000e+00 : f32
    %147 = vector.broadcast %cst_35 : f32 to vector<16x64xf32>
    %148 = arith.maximumf %146, %147 : vector<16x64xf32>
    %cst_36 = arith.constant dense<0.000000e+00> : vector<16x32xf32>
    %149 = tpu.matmul %148, %5, %cst_36 {dimension_numbers = #tpu.dot_dimension_numbers<[1], [0], [0], [1], [0, 0, 1, 1], [], []>} : vector<16x64xf32>, vector<64x32xf32>, vector<16x32xf32> -> vector<16x32xf32>
    %150 = arith.addf %120, %149 : vector<16x32xf32>
    %151 = vector.broadcast %9 : vector<1x32xf32> to vector<16x32xf32>
    %152 = arith.addf %150, %151 : vector<16x32xf32>
    %c0_37 = arith.constant 0 : index
    %c0_38 = arith.constant 0 : index
    %153 = vector.load %arg4[%c0_37, %c0_38] : memref<16x32xf32, #tpu.memory_space<vmem>>, vector<16x32xf32>
    tpu.vector_store %arg4[%c0_37, %c0_38], %152 {strides = array<i32>} : memref<16x32xf32, #tpu.memory_space<vmem>>, vector<16x32xf32>,
    return
  }
}

</mosaic_0001>

<bundles_post_ra>
// kernel: decoder_layer.1
= control target key start
LH: loop header
LB: loop body
LE: loop exit
PB: predicated region body
PF: predicated region fallthrough
CT: control target
= control target key end

     0   :  { %9 = vsyncpa [#allocation3], 0  ;;  %s2669_s0 = inlined_call_operand.hbm [shape: f32[16,32], index: 0, kind: input, shape index: {}]   ;;  %s2670_s1 = inlined_call_operand.hbm [shape: f32[16,32], index: 1, kind: input, shape index: {}]   ;;  %s2671_s2 = inlined_call_operand.hbm [shape: f32[32,320], index: 2, kind: input, shape index: {}]   ;;  %s2672_s3 = inlined_call_operand.hbm [shape: f32[72,128], index: 3, kind: input, shape index: {}]   ;;  %s2673_s4 = inlined_call_operand.hbm [shape: f32[16,32], index: 4, kind: output, shape index: {}]  }
   0x1   :  { %10 = vsyncpa [#allocation6], 0 }
   0x2   :  { %11 = vsyncpa [#allocation9], 0 }
   0x3   :  { %12 = vsyncpa [#allocation4], 0  ;;  %s2253_s15 = smov [#allocation5]   ;;  %s2254_s17 = smov [#allocation2]  }
   0x4   :  { %s30_s16 = sshll.u32 %s2253_s15, 4  ;;  %s18_s18 = sshll.u32 %s2254_s17, 4  ;;  %s31_s16 = int_to_ptr.vmem [resolvable:$true] %s30_s16  ;;  %s19_s18 = int_to_ptr.vmem [resolvable:$true] %s18_s18 }
   0x5   :  { %s2153_s19 = scalar_lea.vmem %s31_s16, 256  ;;  %p2158_p1 = scmp.lt.s32.totalorder %s31_s16, %s31_s16 }
   0x6   :  { %p2154_p0 = scmp.ne.s32.totalorder %s31_s16, %s2153_s19  ;;  %p2159_p2 = scmp.lt.s32.totalorder %s2153_s19, %s2153_s19 }
   0x8   :  { %p2160_p3 = por %p2159_p2, %p2158_p1 }
   0xa   :  { %p2161_p4 = pnand %p2160_p3, %p2154_p0 }
   0xc   :  { %2164 = shalt.err (!%p2161_p4)
}
   0xd   :  { %s2255_s20 = smov 128   ;;  %s2256_s21 = smov 8  }
   0xe   :  { %36 = dma.hbm_to_vmem [thread:$0]  %s2670_s1, 256, %s31_s16, [#allocation6], %s2255_s20, %s2255_s20, %s2256_s21  }
   0xf   :  { %s2173_s24 = scalar_lea.vmem %s19_s18, 256  ;;  %p2178_p6 = scmp.lt.s32.totalorder %s19_s18, %s19_s18 }
  0x10   :  { %p2174_p5 = scmp.ne.s32.totalorder %s19_s18, %s2173_s24  ;;  %p2179_p7 = scmp.lt.s32.totalorder %s2173_s24, %s2173_s24 }
  0x12   :  { %p2180_p8 = por %p2179_p7, %p2178_p6 }
  0x14   :  { %p2181_p9 = pnand %p2180_p8, %p2174_p5 }
  0x16   :  { %2184 = shalt.err (!%p2181_p9)
}
  0x17   :  { %24 = dma.hbm_to_vmem [thread:$0]  %s2669_s0, 256, %s19_s18, [#allocation3], %s2255_s20, %s2255_s20, %s2256_s21  }
  0x18   :  { %s2257_s27 = smov [#allocation7]  }
  0x19   :  { %s42_s28 = sshll.u32 %s2257_s27, 4  ;;  %s43_s28 = int_to_ptr.vmem [resolvable:$true] %s42_s28 }
  0x1a   :  { %s2193_s29 = scalar_lea.vmem %s43_s28, 1536  ;;  %p2198_p11 = scmp.lt.s32.totalorder %s43_s28, %s43_s28 }
  0x1b   :  { %p2194_p10 = scmp.ne.s32.totalorder %s43_s28, %s2193_s29  ;;  %p2199_p12 = scmp.lt.s32.totalorder %s2193_s29, %s2193_s29 }
  0x1d   :  { %p2200_p13 = por %p2199_p12, %p2198_p11 }
  0x1f   :  { %p2201_p0 = pnand %p2200_p13, %p2194_p10 }
  0x21   :  { %2204 = shalt.err (!%p2201_p0)
}
  0x22   :  { %s2258_s1 = smov 384   ;;  %s2259_s30 = smov 24  }
  0x23   :  { %48 = dma.hbm_to_vmem [thread:$0]  %s2671_s2, 1536, %s43_s28, [#allocation6], %s2258_s1, %s2258_s1, %s2259_s30  }
  0x24   :  { %s2260_s7 = smov [#allocation8]  }
  0x25   :  { %s54_s8 = sshll.u32 %s2260_s7, 4  ;;  %s55_s8 = int_to_ptr.vmem [resolvable:$true] %s54_s8 }
  0x26   :  { %s2213_s0 = scalar_lea.vmem %s55_s8, 1152  ;;  %p2218_p2 = scmp.lt.s32.totalorder %s55_s8, %s55_s8 }
  0x27   :  { %p2214_p1 = scmp.ne.s32.totalorder %s55_s8, %s2213_s0  ;;  %p2219_p3 = scmp.lt.s32.totalorder %s2213_s0, %s2213_s0 }
  0x29   :  { %p2220_p4 = por %p2219_p3, %p2218_p2 }
  0x2b   :  { %p2221_p5 = pnand %p2220_p4, %p2214_p1 }
  0x2d   :  { %2224 = shalt.err (!%p2221_p5)
}
  0x2e   :  { %60 = dma.hbm_to_vmem [thread:$0]  %s2672_s3, 1152, %s55_s8, [#allocation9], %s2255_s20, %s2255_s20, %s2256_s21  }
  0x2f   :  { %2245 = dma.done.wait [#allocation3], 256  }
  0x30   :  { %2246 = vsyncadd [#allocation3], 4294967040 }
  0x31   :  { %2247 = dma.done.wait [#allocation6], 1792  }
  0x32   :  { %2248 = vsyncadd [#allocation6], 4294965504 }
  0x33   :  { %2249 = dma.done.wait [#allocation9], 1152  }
  0x34   :  { %2250 = vsyncadd [#allocation9], 4294966144  ;;  %vm114_vm0 = vcmask 261120   ;;  %v2312_v0 = vld [vmem:[#allocation2] sm:$0xff]  ;;  %v2314_v1 = vld [vmem:[#allocation2 + $0x8] sm:$0xff]  ;;  %s2261_s2 = smov 96   ;;  %v218_v33 = vlaneseq }
  0x35   :  { %v196_v2 = vsel %vm114_vm0, %v2312_v0, 0.0  ;;  %v199_v3 = vsel %vm114_vm0, %v2314_v1, 0.0  ;;  %v2320_v4 = vld [vmem:[#allocation7 + $0x50] sm:$0xff]  ;;  %v2336_v15 = vld [vmem:[#allocation7 + $0x38] sm:$0xff]  ;;  %v2340_v16 = vld [vmem:[#allocation7 + $0x20] sm:$0xff]  ;;  %s2262_s3 = smov 64  }
  0x36   :  { %197 = vadd.xlane.f32.xlu0 %v196_v2  ;;  %v2344_v17 = vld [vmem:[#allocation7 + $0x8] sm:$0xff]  ;;  %v75_v19 = vld [vmem:[#allocation5] sm:$0xff]  ;;  %v76_v28 = vld [vmem:[#allocation5 + $0x8] sm:$0xff]  ;;  %v2362_v42 = vshrl.u32 %v218_v33, 7  ;;  %vm510_vm5 = vcmask 130048   ;;  %s2263_s11 = smov 32  }
  0x37   :  { %1897 = vmatprep.mubr.msk.f32.mxu1 %vm114_vm0, %v75_v19  ;;  %v2349_v29 = vld [vmem:[#allocation7 + $0x48] sm:$0xff]  ;;  %v2351_v32 = vld [vmem:[#allocation7 + $0x30] sm:$0xff]  ;;  %v2356_v37 = vld [vmem:[#allocation7 + $0x18] sm:$0xff]  ;;  %s2264_s12 = smov 48   ;;  %vm1642_vm14 = vcmask 523264   ;;  %s2265_s13 = smov [#allocation10]  }
  0x38   :  { %v2360_v41 = vld [vmem:[#allocation7] sm:$0xff]  ;;  %v220_v46 = vsub.s32 2, %v2362_v42  ;;  %v246_v49 = vsub.s32 3, %v2362_v42  ;;  %s1739_s14 = sshll.u32 %s2265_s13, 4  ;;  %s1740_s14 = int_to_ptr.vmem [resolvable:$true] %s1739_s14 }
  0x39   :  { %v2369_v47 = vld [vmem:[#allocation8 + $0x40] sm:$0xff]  ;;  %s2225_s15 = scalar_lea.vmem %s1740_s14, 256  ;;  %p2230_p7 = scmp.lt.s32.totalorder %s1740_s14, %s1740_s14 }
  0x3a   :  { %200 = vadd.xlane.f32.xlu0 %v199_v3  ;;  %v221_v48 = vrot.slane %v2369_v47, %v220_v46  ;;  %v247_v51 = vrot.slane %v2369_v47, %v246_v49  ;;  %v2384_v62 = vld [vmem:[#allocation8] sm:$0xff]  ;;  %v2395_v3 = vld [vmem:[#allocation8 + $0x8] sm:$0xff]  ;;  %p2226_p6 = scmp.ne.s32.totalorder %s1740_s14, %s2225_s15  ;;  %p2231_p8 = scmp.lt.s32.totalorder %s2225_s15, %s2225_s15 }
  0x3c   :  { %p2232_p9 = por %p2231_p8, %p2230_p7 }
  0x3e   :  { %p2233_p10 = pnand %p2232_p9, %p2226_p6 }
  0x50   :  { %108 = vrot.lane.b32.xlu0 %v2320_v4, %s2261_s2 }
  0xbf   :  { %v198_v5 = vpop.xlane.xlu0 %197 }
  0xc0   :  { %v203_v6 = vmul.f32 0.03125, %v198_v5  ;;  %v2401_v5 = vld [vmem:[#allocation8 + $0x10] sm:$0xff] }
  0xc2   :  { %v2325_v7 = vsub.f32 %v2312_v0, %v203_v6  ;;  %v2403_v6 = vld [vmem:[#allocation8 + $0x18] sm:$0xff] }
  0xc3   :  { %v201_v8 = vpop.xlane.xlu0 %200 }
  0xc4   :  { %v204_v9 = vmul.f32 0.03125, %v201_v8  ;;  %v207_v10 = vmul.f32 %v2325_v7, %v2325_v7  ;;  %v222_v50 = vmul.f32 %v221_v48, %v2325_v7  ;;  %v2409_v7 = vld [vmem:[#allocation8 + $0x20] sm:$0xff]  ;;  %v2411_v8 = vld [vmem:[#allocation8 + $0x28] sm:$0xff] }
  0xc6   :  { %v2330_v11 = vsub.f32 %v2314_v1, %v204_v9  ;;  %v209_v12 = vsel %vm114_vm0, %v207_v10, 0.0  ;;  %v2417_v9 = vld [vmem:[#allocation8 + $0x30] sm:$0xff]  ;;  %v2419_v10 = vld [vmem:[#allocation8 + $0x38] sm:$0xff] }
  0xc7   :  { %210 = vadd.xlane.f32.xlu1 %v209_v12  ;;  %v109_v18 = vpop.permute.xlu0 %108 }
  0xc8   :  { %v208_v13 = vmul.f32 %v2330_v11, %v2330_v11  ;;  %1889 = vmatprep.subr.mxu1 %v109_v18  ;;  %v223_v54 = vmul.f32 %v221_v48, %v2330_v11 }
  0xc9   :  { %1890 = vmatpush3.msra.mxu1 %v109_v18 }
  0xca   :  { %v212_v14 = vsel %vm114_vm0, %v208_v13, 0.0 }
  0xcb   :  { %213 = vadd.xlane.f32.xlu1 %v212_v14 }
  0xdc   :  { %106 = vrot.lane.b32.xlu1 %v2336_v15, %s2261_s2 }
  0xe0   :  { %104 = vrot.lane.b32.xlu1 %v2340_v16, %s2261_s2 }
  0xe4   :  { %102 = vrot.lane.b32.xlu1 %v2344_v17, %s2261_s2 }
 0x150   :  { %v211_v20 = vpop.xlane.xlu1 %210 }
 0x151   :  { %v216_v21 = vmul.f32 0.032258064, %v211_v20 }
 0x153   :  { %2051 = vrsqrt.f32 %v216_v21  ;;  %vm226_vm1 = vcmp.eq.f32.partialorder %v216_v21, inf  ;;  %v229_v31 = vand.u32 2147483648, %v216_v21  ;;  %vm228_vm2 = vcmp.eq.f32.partialorder %v216_v21, 0.0 }
 0x154   :  { %v214_v22 = vpop.xlane.xlu1 %213 }
 0x155   :  { %v217_v23 = vmul.f32 0.032258064, %v214_v22 }
 0x157   :  { %2053 = vrsqrt.f32 %v217_v23  ;;  %vm233_vm3 = vcmp.eq.f32.partialorder %v217_v23, inf  ;;  %v236_v40 = vand.u32 2147483648, %v217_v23  ;;  %vm235_vm4 = vcmp.eq.f32.partialorder %v217_v23, 0.0 }
 0x158   :  { %v107_v24 = vpop.permute.xlu1 %106 }
 0x159   :  { %1891 = vmatprep.subr.mxu1 %v107_v24 }
 0x15a   :  { %1892 = vmatpush3.msra.mxu1 %v107_v24 }
 0x15c   :  { %v105_v25 = vpop.permute.xlu1 %104 }
 0x15d   :  { %1893 = vmatprep.subr.mxu1 %v105_v25 }
 0x15e   :  { %1894 = vmatpush3.msra.mxu1 %v105_v25 }
 0x160   :  { %v2052_v26 = vpop.eup %2051  ;;  %v103_v27 = vpop.permute.xlu1 %102 }
 0x161   :  { %v225_v30 = vmul.f32 %v2052_v26, %v216_v21  ;;  %1895 = vmatprep.subr.mxu1 %v103_v27 }
 0x162   :  { %1896 = vmatpush3.msra.mxu1 %v103_v27 }
 0x163   :  { %v227_v34 = vsel %vm226_vm1, %v216_v21, %v225_v30  ;;  %1898 = vmatmul.mubr.msk.f32.vlgmr.msra.gmra.mxu1 %vm114_vm0, %v76_v28  ;;  %1900 = vmatprep.subr.mxu1 %v2349_v29 }
 0x164   :  { %v2054_v35 = vpop.eup %2053  ;;  %v230_v36 = vsel %vm228_vm2, %v229_v31, %v227_v34  ;;  %1901 = vmatpush3.msra.mxu1 %v2349_v29 }
 0x165   :  { %v238_v38 = vadd.f32 1e-06, %v230_v36  ;;  %v232_v39 = vmul.f32 %v2054_v35, %v217_v23  ;;  %1902 = vmatprep.subr.mxu1 %v2351_v32 }
 0x166   :  { %1903 = vmatpush3.msra.mxu1 %v2351_v32 }
 0x167   :  { %2055 = vrcp.f32 %v238_v38  ;;  %v234_v43 = vsel %vm233_vm3, %v217_v23, %v232_v39  ;;  %1904 = vmatprep.subr.mxu1 %v2356_v37 }
 0x168   :  { %v237_v44 = vsel %vm235_vm4, %v236_v40, %v234_v43  ;;  %1905 = vmatpush3.msra.mxu1 %v2356_v37 }
 0x169   :  { %v239_v45 = vadd.f32 1e-06, %v237_v44  ;;  %1906 = vmatprep.subr.mxu1 %v2360_v41 }
 0x16a   :  { %1907 = vmatpush3.msra.mxu1 %v2360_v41 }
 0x16b   :  { %2057 = vrcp.f32 %v239_v45 }
 0x174   :  { %v2056_v52 = vpop.eup %2055 }
 0x175   :  { %v241_v53 = vmul.f32 %v2056_v52, %v222_v50 }
 0x177   :  { %v248_v55 = vadd.f32 %v247_v51, %v241_v53 }
 0x178   :  { %v2058_v56 = vpop.eup %2057 }
 0x179   :  { %v243_v57 = vmul.f32 %v2058_v56, %v223_v54  ;;  %1908 = vmatprep.mubr.msk.f32.mxu1 %vm114_vm0, %v248_v55 }
 0x17b   :  { %v249_v58 = vadd.f32 %v247_v51, %v243_v57 }
 0x17d   :  { %1909 = vmatmul.mubr.msk.f32.vlgmr.msra.gmra.mxu1 %vm114_vm0, %v249_v58 }
 0x223   :  { %v2378_v59 = vpop.f32.mrf.mxu1 }
 0x225   :  { %v2380_v60 = vpop.f32.mrf.mxu1 }
 0x23d   :  { %v2382_v61 = vpop.f32.mrf.mxu1 }
 0x23e   :  { %343 = vrot.lane.b32.xlu0 %v2382_v61, %s2261_s2  ;;  %v332_v13 = vmul.f32 %v2382_v61, %v2395_v3  ;;  %v334_v18 = vmul.f32 %v2382_v61, %v2403_v6  ;;  %v338_v21 = vmul.f32 %v2382_v61, %v2419_v10 }
 0x23f   :  { %v2388_v63 = vpop.f32.mrf.mxu1 }
 0x240   :  { %341 = vrot.lane.b32.xlu1 %v2388_v63, %s2261_s2  ;;  %v331_v2 = vmul.f32 %v2388_v63, %v2384_v62  ;;  %v333_v14 = vmul.f32 %v2388_v63, %v2401_v5  ;;  %v335_v19 = vmul.f32 %v2388_v63, %v2409_v7  ;;  %v337_v20 = vmul.f32 %v2388_v63, %v2417_v9 }
 0x242   :  { %1915 = vmatprep.mubr.msk.f32.mxu0 %vm114_vm0, %v331_v2  ;;  %353 = vrot.lane.b32.xlu0 %v2384_v62, %s2262_s3 }
 0x244   :  { %355 = vrot.lane.b32.xlu1 %v2395_v3, %s2262_s3 }
 0x246   :  { %357 = vrot.lane.b32.xlu0 %v2401_v5, %s2262_s3 }
 0x248   :  { %359 = vrot.lane.b32.xlu1 %v2403_v6, %s2262_s3 }
 0x24a   :  { %361 = vrot.lane.b32.xlu0 %v2409_v7, %s2262_s3 }
 0x24c   :  { %363 = vrot.lane.b32.xlu1 %v2411_v8, %s2262_s3 }
 0x24e   :  { %365 = vrot.lane.b32.xlu0 %v2417_v9, %s2262_s3 }
 0x250   :  { %367 = vrot.lane.b32.xlu1 %v2419_v10, %s2262_s3 }
 0x2b0   :  { %v344_v11 = vpop.permute.xlu0 %343 }
 0x2b1   :  { %1911 = vmatprep.subr.msk.mxu0 %vm114_vm0, %v344_v11 }
 0x2b2   :  { %1912 = vmatpush3.xpose.msk.msra.mxu0 %vm114_vm0, %v344_v11  ;;  %v342_v12 = vpop.permute.xlu1 %341 }
 0x2b3   :  { %1913 = vmatprep.subr.msk.mxu0 %vm114_vm0, %v342_v12 }
 0x2b4   :  { %v354_v23 = vpop.permute.xlu0 %353 }
 0x2b6   :  { %1914 = vmatpush3.xpose.msk.msra.mxu0 %vm114_vm0, %v342_v12  ;;  %v356_v22 = vpop.permute.xlu1 %355 }
 0x2b7   :  { %1954 = vmatprep.subr.mxu0 %v2320_v4 }
 0x2b8   :  { %v358_v28 = vpop.permute.xlu0 %357 }
 0x2b9   :  { %1916 = vmatmul.mubr.msk.f32.vlgmr.msra.gmra.mxu0 %vm114_vm0, %v332_v13 }
 0x2ba   :  { %1918 = vmatprep.mubr.msk.f32.mxu0 %vm114_vm0, %v333_v14  ;;  %1955 = vmatpush3.msra.mxu0 %v2320_v4  ;;  %v336_v4 = vmul.f32 %v2382_v61, %v2411_v8  ;;  %v360_v24 = vpop.permute.xlu1 %359 }
 0x2bb   :  { %1956 = vmatprep.subr.mxu0 %v2336_v15 }
 0x2bc   :  { %1957 = vmatpush3.msra.mxu0 %v2336_v15  ;;  %v362_v40 = vpop.permute.xlu0 %361 }
 0x2bd   :  { %1919 = vmatmul.mubr.msk.f32.gmra.mxu0 %vm114_vm0, %v334_v18  ;;  %1958 = vmatprep.subr.mxu0 %v2340_v16 }
 0x2be   :  { %1921 = vmatprep.mubr.msk.f32.mxu0 %vm114_vm0, %v335_v19  ;;  %1959 = vmatpush3.msra.mxu0 %v2340_v16  ;;  %v364_v34 = vpop.permute.xlu1 %363 }
 0x2bf   :  { %1960 = vmatprep.subr.mxu0 %v2344_v17 }
 0x2c0   :  { %1961 = vmatpush3.msra.mxu0 %v2344_v17  ;;  %v366_v54 = vpop.permute.xlu0 %365 }
 0x2c1   :  { %1922 = vmatmul.mubr.msk.f32.gmra.mxu0 %vm114_vm0, %v336_v4 }
 0x2c2   :  { %1924 = vmatprep.mubr.msk.f32.mxu0 %vm114_vm0, %v337_v20  ;;  %v368_v48 = vpop.permute.xlu1 %367 }
 0x2c5   :  { %1925 = vmatmul.mubr.msk.f32.gmra.mxu0 %vm114_vm0, %v338_v21 }
 0x379   :  { %v1917_v25 = vpop.f32.mrf.mxu0 }
 0x37a   :  { %v477_v26 = vadd.f32 %v1917_v25, %v356_v22 }
 0x37b   :  { %v471_v27 = vpop.f32.mrf.mxu0 }
 0x37c   :  { %v472_v30 = vadd.f32 %v471_v27, %v354_v23  ;;  %v514_v31 = vsel %vm510_vm5, %v477_v26, -inf }
 0x37d   :  { %515 = vmax.xlane.f32.xlu1 %v514_v31  ;;  %v1920_v33 = vpop.f32.mrf.mxu0 }
 0x37e   :  { %v487_v35 = vadd.f32 %v1920_v33, %v360_v24  ;;  %v511_v36 = vsel %vm510_vm5, %v472_v30, -inf }
 0x37f   :  { %v481_v38 = vpop.f32.mrf.mxu0  ;;  %512 = vmax.xlane.f32.xlu0 %v511_v36 }
 0x380   :  { %v482_v43 = vadd.f32 %v481_v38, %v358_v28  ;;  %v520_v45 = vsel %vm510_vm5, %v487_v35, -inf }
 0x381   :  { %v1923_v39 = vpop.f32.mrf.mxu0 }
 0x382   :  { %v497_v44 = vadd.f32 %v1923_v39, %v364_v34  ;;  %v517_v53 = vsel %vm510_vm5, %v482_v43, -inf }
 0x383   :  { %v491_v46 = vpop.f32.mrf.mxu0  ;;  %521 = vmax.xlane.f32.xlu0 %v520_v45 }
 0x384   :  { %v526_v49 = vsel %vm510_vm5, %v497_v44, -inf  ;;  %v492_v51 = vadd.f32 %v491_v46, %v362_v40 }
 0x385   :  { %527 = vmax.xlane.f32.xlu1 %v526_v49  ;;  %v1926_v50 = vpop.f32.mrf.mxu0 }
 0x386   :  { %v507_v52 = vadd.f32 %v1926_v50, %v368_v48  ;;  %v523_v58 = vsel %vm510_vm5, %v492_v51, -inf }
 0x387   :  { %v501_v55 = vpop.f32.mrf.mxu0  ;;  %518 = vmax.xlane.f32.xlu0 %v517_v53 }
 0x388   :  { %v532_v56 = vsel %vm510_vm5, %v507_v52, -inf  ;;  %v502_v57 = vadd.f32 %v501_v55, %v366_v54 }
 0x389   :  { %533 = vmax.xlane.f32.xlu1 %v532_v56 }
 0x38a   :  { %v529_v2 = vsel %vm510_vm5, %v502_v57, -inf }
 0x38b   :  { %524 = vmax.xlane.f32.xlu0 %v523_v58 }
 0x38f   :  { %530 = vmax.xlane.f32.xlu0 %v529_v2 }
 0x406   :  { %v516_v11 = vpop.xlane.xlu1 %515 }
 0x407   :  { %v536_v12 = vsub.f32 %v477_v26, %v516_v11 }
 0x408   :  { %v513_v13 = vpop.xlane.xlu0 %512 }
 0x409   :  { %v545_v14 = vmul.f32 1.442695, %v536_v12  ;;  %v535_v18 = vsub.f32 %v472_v30, %v513_v13 }
 0x40b   :  { %2059 = vpow2.f32 %v545_v14  ;;  %v543_v19 = vmul.f32 1.442695, %v535_v18 }
 0x40c   :  { %v522_v4 = vpop.xlane.xlu0 %521 }
 0x40d   :  { %2061 = vpow2.f32 %v543_v19  ;;  %v538_v20 = vsub.f32 %v487_v35, %v522_v4 }
 0x40e   :  { %v528_v21 = vpop.xlane.xlu1 %527 }
 0x40f   :  { %v549_v22 = vmul.f32 1.442695, %v538_v20  ;;  %v540_v23 = vsub.f32 %v497_v44, %v528_v21 }
 0x410   :  { %v519_v24 = vpop.xlane.xlu0 %518 }
 0x411   :  { %2063 = vpow2.f32 %v549_v22  ;;  %v553_v25 = vmul.f32 1.442695, %v540_v23  ;;  %v537_v27 = vsub.f32 %v482_v43, %v519_v24 }
 0x412   :  { %v534_v28 = vpop.xlane.xlu1 %533 }
 0x413   :  { %2065 = vpow2.f32 %v553_v25  ;;  %v547_v31 = vmul.f32 1.442695, %v537_v27  ;;  %v542_v33 = vsub.f32 %v507_v52, %v534_v28 }
 0x414   :  { %v525_v26 = vpop.xlane.xlu0 %524 }
 0x415   :  { %2067 = vpow2.f32 %v547_v31  ;;  %v557_v34 = vmul.f32 1.442695, %v542_v33  ;;  %v539_v30 = vsub.f32 %v492_v51, %v525_v26 }
 0x417   :  { %2069 = vpow2.f32 %v557_v34  ;;  %v551_v36 = vmul.f32 1.442695, %v539_v30 }
 0x418   :  { %v2466_v38 = vpop.eup %2059  ;;  %v531_v35 = vpop.xlane.xlu0 %530 }
 0x419   :  { %2071 = vpow2.f32 %v551_v36  ;;  %v541_v39 = vsub.f32 %v502_v57, %v531_v35  ;;  %v562_v40 = vsel %vm510_vm5, %v2466_v38, 0.0 }
 0x41a   :  { %v2062_v44 = vpop.eup %2061  ;;  %563 = vadd.xlane.f32.xlu1 %v562_v40 }
 0x41b   :  { %v555_v43 = vmul.f32 1.442695, %v541_v39  ;;  %v559_v45 = vsel %vm510_vm5, %v2062_v44, 0.0 }
 0x41c   :  { %560 = vadd.xlane.f32.xlu0 %v559_v45 }
 0x41d   :  { %2073 = vpow2.f32 %v555_v43 }
 0x41e   :  { %v2471_v46 = vpop.eup %2063 }
 0x41f   :  { %v568_v48 = vsel %vm510_vm5, %v2471_v46, 0.0 }
 0x420   :  { %v2475_v49 = vpop.eup %2065  ;;  %569 = vadd.xlane.f32.xlu1 %v568_v48 }
 0x421   :  { %v574_v51 = vsel %vm510_vm5, %v2475_v49, 0.0 }
 0x422   :  { %v2068_v50 = vpop.eup %2067 }
 0x423   :  { %v565_v52 = vsel %vm510_vm5, %v2068_v50, 0.0 }
 0x424   :  { %v2480_v53 = vpop.eup %2069  ;;  %575 = vadd.xlane.f32.xlu1 %v574_v51  ;;  %566 = vadd.xlane.f32.xlu0 %v565_v52 }
 0x425   :  { %v580_v55 = vsel %vm510_vm5, %v2480_v53, 0.0 }
 0x426   :  { %v2072_v54 = vpop.eup %2071 }
 0x427   :  { %v571_v56 = vsel %vm510_vm5, %v2072_v54, 0.0 }
 0x428   :  { %581 = vadd.xlane.f32.xlu1 %v580_v55  ;;  %572 = vadd.xlane.f32.xlu0 %v571_v56 }
 0x42a   :  { %v2074_v57 = vpop.eup %2073 }
 0x42b   :  { %v577_v58 = vsel %vm510_vm5, %v2074_v57, 0.0 }
 0x42c   :  { %578 = vadd.xlane.f32.xlu0 %v577_v58 }
 0x439   :  { %599 = vrot.lane.b32.xlu1 %v2388_v63, %s2262_s3 }
 0x43d   :  { %758 = vrot.lane.b32.xlu1 %v2349_v29, %s2263_s11 }
 0x441   :  { %756 = vrot.lane.b32.xlu1 %v2351_v32, %s2263_s11 }
 0x442   :  { %601 = vrot.lane.b32.xlu0 %v2382_v61, %s2262_s3 }
 0x445   :  { %752 = vrot.lane.b32.xlu1 %v2360_v41, %s2263_s11 }
 0x446   :  { %754 = vrot.lane.b32.xlu0 %v2356_v37, %s2263_s11 }
 0x4a3   :  { %v564_v2 = vpop.xlane.xlu1 %563 }
 0x4a5   :  { %v561_v11 = vpop.xlane.xlu0 %560 }
 0x4a6   :  { %2075 = vrcp.f32 %v561_v11 }
 0x4a7   :  { %2077 = vrcp.f32 %v564_v2 }
 0x4a9   :  { %v570_v63 = vpop.xlane.xlu1 %569 }
 0x4ad   :  { %v576_v12 = vpop.xlane.xlu1 %575  ;;  %v567_v13 = vpop.xlane.xlu0 %566 }
 0x4ae   :  { %2079 = vrcp.f32 %v567_v13 }
 0x4af   :  { %2081 = vrcp.f32 %v570_v63 }
 0x4b1   :  { %v582_v29 = vpop.xlane.xlu1 %581  ;;  %v573_v32 = vpop.xlane.xlu0 %572 }
 0x4b2   :  { %2083 = vrcp.f32 %v573_v32 }
 0x4b3   :  { %v2076_v14 = vpop.eup %2075  ;;  %2085 = vrcp.f32 %v576_v12 }
 0x4b4   :  { %v584_v61 = vmul.f32 %v2076_v14, %v2062_v44  ;;  %v2078_v37 = vpop.eup %2077 }
 0x4b5   :  { %v600_v18 = vpop.permute.xlu1 %599  ;;  %v579_v41 = vpop.xlane.xlu0 %578  ;;  %v586_v21 = vmul.f32 %v2078_v37, %v2466_v38 }
 0x4b6   :  { %2087 = vrcp.f32 %v579_v41  ;;  %1931 = vmatprep.mubr.msk.f32.mxu1 %vm510_vm5, %v584_v61 }
 0x4b7   :  { %2089 = vrcp.f32 %v582_v29 }
 0x4b9   :  { %v602_v19 = vpop.permute.xlu0 %601  ;;  %v759_v4 = vpop.permute.xlu1 %758 }
 0x4ba   :  { %1927 = vmatprep.subr.mxu1 %v602_v19 }
 0x4bb   :  { %1928 = vmatpush3.msra.mxu1 %v602_v19  ;;  %v2080_v20 = vpop.eup %2079 }
 0x4bc   :  { %1929 = vmatprep.subr.mxu1 %v600_v18  ;;  %v2082_v22 = vpop.eup %2081  ;;  %v588_v24 = vmul.f32 %v2080_v20, %v2068_v50 }
 0x4bd   :  { %1930 = vmatpush3.msra.mxu1 %v600_v18  ;;  %v757_v23 = vpop.permute.xlu1 %756  ;;  %v755_v25 = vpop.permute.xlu0 %754  ;;  %v590_v28 = vmul.f32 %v2082_v22, %v2471_v46 }
 0x4be   :  { %1932 = vmatmul.mubr.msk.f32.vlgmr.msra.gmra.mxu1 %vm510_vm5, %v586_v21  ;;  %1943 = vmatprep.subr.mxu1 %v759_v4 }
 0x4bf   :  { %1934 = vmatprep.mubr.msk.f32.mxu1 %vm510_vm5, %v588_v24  ;;  %1944 = vmatpush3.msra.mxu1 %v759_v4  ;;  %v2084_v27 = vpop.eup %2083 }
 0x4c0   :  { %1945 = vmatprep.subr.mxu1 %v757_v23  ;;  %v2086_v31 = vpop.eup %2085  ;;  %v592_v26 = vmul.f32 %v2084_v27, %v2072_v54 }
 0x4c1   :  { %1946 = vmatpush3.msra.mxu1 %v757_v23  ;;  %v753_v33 = vpop.permute.xlu1 %752  ;;  %v594_v30 = vmul.f32 %v2086_v31, %v2475_v49 }
 0x4c2   :  { %1935 = vmatmul.mubr.msk.f32.gmra.mxu1 %vm510_vm5, %v590_v28  ;;  %1947 = vmatprep.subr.mxu1 %v755_v25 }
 0x4c3   :  { %v2088_v34 = vpop.eup %2087  ;;  %1937 = vmatprep.mubr.msk.f32.mxu1 %vm510_vm5, %v592_v26  ;;  %1948 = vmatpush3.msra.mxu1 %v755_v25 }
 0x4c4   :  { %1949 = vmatprep.subr.mxu1 %v753_v33  ;;  %v596_v36 = vmul.f32 %v2088_v34, %v2074_v57  ;;  %v2090_v38 = vpop.eup %2089 }
 0x4c5   :  { %1950 = vmatpush3.msra.mxu1 %v753_v33  ;;  %v598_v35 = vmul.f32 %v2090_v38, %v2480_v53 }
 0x4c6   :  { %1938 = vmatmul.mubr.msk.f32.gmra.mxu1 %vm510_vm5, %v594_v30  ;;  %1965 = vmatprep.subr.msk.mxu1 %vm114_vm0, %v2378_v59 }
 0x4c7   :  { %1940 = vmatprep.mubr.msk.f32.mxu1 %vm510_vm5, %v596_v36 }
 0x4ca   :  { %1941 = vmatmul.mubr.msk.f32.gmra.mxu1 %vm510_vm5, %v598_v35 }
 0x57e   :  { %v1933_v39 = vpop.f32.mrf.mxu1 }
 0x57f   :  { %v735_v52 = vmul.f32 %v1933_v39, %v2395_v3 }
 0x580   :  { %v695_v40 = vpop.f32.mrf.mxu1 }
 0x581   :  { %v734_v50 = vmul.f32 %v695_v40, %v2384_v62 }
 0x582   :  { %v1936_v44 = vpop.f32.mrf.mxu1 }
 0x583   :  { %v737_v48 = vmul.f32 %v1936_v44, %v2403_v6 }
 0x584   :  { %v705_v43 = vpop.f32.mrf.mxu1 }
 0x585   :  { %v736_v46 = vmul.f32 %v705_v43, %v2401_v5  ;;  %v743_v56 = vadd.f32 %v737_v48, %v735_v52  ;;  %v895_v48 = vsub.s32 5, %v2362_v42 }
 0x586   :  { %v1939_v45 = vpop.f32.mrf.mxu1 }
 0x587   :  { %v739_v53 = vmul.f32 %v1939_v45, %v2411_v8  ;;  %v742_v55 = vadd.f32 %v736_v46, %v734_v50  ;;  %v869_v46 = vsub.s32 4, %v2362_v42 }
 0x588   :  { %v715_v49 = vpop.f32.mrf.mxu1 }
 0x589   :  { %v738_v51 = vmul.f32 %v715_v49, %v2409_v7  ;;  %v745_v63 = vadd.f32 %v743_v56, %v739_v53  ;;  %v870_v49 = vrot.slane %v2369_v47, %v869_v46 }
 0x58a   :  { %v1942_v54 = vpop.f32.mrf.mxu1 }
 0x58b   :  { %v741_v57 = vmul.f32 %v1942_v54, %v2419_v10  ;;  %v744_v2 = vadd.f32 %v742_v55, %v738_v51  ;;  %v896_v51 = vrot.slane %v2369_v47, %v895_v48 }
 0x58c   :  { %v725_v58 = vpop.f32.mrf.mxu1 }
 0x58d   :  { %v740_v11 = vmul.f32 %v725_v58, %v2417_v9  ;;  %v747_v13 = vadd.f32 %v745_v63, %v741_v57 }
 0x58f   :  { %v746_v12 = vadd.f32 %v744_v2, %v740_v11 }
 0x591   :  { %1951 = vmatprep.mubr.msk.f32.mxu1 %vm114_vm0, %v746_v12 }
 0x592   :  { %1952 = vmatmul.mubr.msk.f32.vlgmr.msra.gmra.mxu1 %vm114_vm0, %v747_v13 }
 0x593   :  { %1966 = vmatpush3.xpose.msk.msra.mxu1 %vm114_vm0, %v2378_v59 }
 0x594   :  { %1967 = vmatprep.subr.msk.mxu1 %vm114_vm0, %v2380_v60 }
 0x597   :  { %1968 = vmatpush3.xpose.msk.msra.mxu1 %vm114_vm0, %v2380_v60 }
 0x652   :  { %v1953_v29 = vpop.f32.mrf.mxu1 }
 0x653   :  { %v2529_v32 = vadd.f32 %v1953_v29, %v2314_v1 }
 0x654   :  { %v836_v14 = vpop.f32.mrf.mxu1 }
 0x655   :  { %v2532_v61 = vadd.f32 %v836_v14, %v2312_v0  ;;  %v850_v18 = vsel %vm114_vm0, %v2529_v32, 0.0 }
 0x656   :  { %851 = vadd.xlane.f32.xlu1 %v850_v18 }
 0x657   :  { %v847_v41 = vsel %vm114_vm0, %v2532_v61, 0.0 }
 0x658   :  { %848 = vadd.xlane.f32.xlu0 %v847_v41 }
 0x667   :  { %990 = vrot.lane.b32.xlu1 %v2395_v3, %s2264_s12 }
 0x66b   :  { %992 = vrot.lane.b32.xlu1 %v2401_v5, %s2264_s12 }
 0x66f   :  { %994 = vrot.lane.b32.xlu1 %v2403_v6, %s2264_s12 }
 0x673   :  { %998 = vrot.lane.b32.xlu1 %v2411_v8, %s2264_s12 }
 0x677   :  { %1002 = vrot.lane.b32.xlu1 %v2419_v10, %s2264_s12 }
 0x6df   :  { %v852_v37 = vpop.xlane.xlu1 %851 }
 0x6e0   :  { %v854_v19 = vmul.f32 0.03125, %v852_v37 }
 0x6e1   :  { %v849_v4 = vpop.xlane.xlu0 %848 }
 0x6e2   :  { %v853_v20 = vmul.f32 0.03125, %v849_v4  ;;  %v856_v21 = vsub.f32 %v2529_v32, %v854_v19 }
 0x6e3   :  { %v991_v37 = vpop.permute.xlu1 %990 }
 0x6e4   :  { %v855_v1 = vsub.f32 %v2532_v61, %v853_v20  ;;  %v858_v23 = vmul.f32 %v856_v21, %v856_v21  ;;  %v872_v54 = vmul.f32 %v870_v49, %v856_v21 }
 0x6e6   :  { %v857_v22 = vmul.f32 %v855_v1, %v855_v1  ;;  %v862_v24 = vsel %vm114_vm0, %v858_v23, 0.0  ;;  %v871_v50 = vmul.f32 %v870_v49, %v855_v1 }
 0x6e7   :  { %v993_v19 = vpop.permute.xlu1 %992 }
 0x6e8   :  { %v859_v0 = vsel %vm114_vm0, %v857_v22, 0.0 }
 0x6e9   :  { %860 = vadd.xlane.f32.xlu0 %v859_v0 }
 0x6eb   :  { %v995_v4 = vpop.permute.xlu1 %994 }
 0x6ed   :  { %863 = vadd.xlane.f32.xlu0 %v862_v24 }
 0x703   :  { %988 = vrot.lane.b32.xlu0 %v2384_v62, %s2264_s12 }
 0x707   :  { %996 = vrot.lane.b32.xlu0 %v2409_v7, %s2264_s12 }
 0x70b   :  { %1000 = vrot.lane.b32.xlu0 %v2417_v9, %s2264_s12 }
 0x772   :  { %v861_v25 = vpop.xlane.xlu0 %860 }
 0x773   :  { %v865_v27 = vmul.f32 0.032258064, %v861_v25  ;;  %v999_v25 = vpop.permute.xlu1 %998 }
 0x775   :  { %2091 = vrsqrt.f32 %v865_v27  ;;  %vm875_vm6 = vcmp.eq.f32.partialorder %v865_v27, inf  ;;  %v878_v34 = vand.u32 2147483648, %v865_v27  ;;  %vm877_vm7 = vcmp.eq.f32.partialorder %v865_v27, 0.0 }
 0x776   :  { %v864_v28 = vpop.xlane.xlu0 %863 }
 0x777   :  { %v866_v31 = vmul.f32 0.032258064, %v864_v28 }
 0x779   :  { %2093 = vrsqrt.f32 %v866_v31  ;;  %vm882_vm8 = vcmp.eq.f32.partialorder %v866_v31, inf  ;;  %v885_v40 = vand.u32 2147483648, %v866_v31  ;;  %vm884_vm9 = vcmp.eq.f32.partialorder %v866_v31, 0.0 }
 0x77a   :  { %v989_v21 = vpop.permute.xlu0 %988 }
 0x782   :  { %v2092_v33 = vpop.eup %2091 }
 0x783   :  { %v874_v26 = vmul.f32 %v2092_v33, %v865_v27 }
 0x785   :  { %v876_v30 = vsel %vm875_vm6, %v865_v27, %v874_v26  ;;  %v997_v26 = vpop.permute.xlu0 %996 }
 0x786   :  { %v2094_v36 = vpop.eup %2093  ;;  %v879_v38 = vsel %vm877_vm7, %v878_v34, %v876_v30 }
 0x787   :  { %v887_v35 = vadd.f32 1e-06, %v879_v38  ;;  %v881_v39 = vmul.f32 %v2094_v36, %v866_v31 }
 0x789   :  { %2095 = vrcp.f32 %v887_v35  ;;  %v883_v44 = vsel %vm882_vm8, %v866_v31, %v881_v39  ;;  %v1003_v35 = vpop.permute.xlu1 %1002  ;;  %v1001_v48 = vpop.permute.xlu0 %1000 }
 0x78a   :  { %v886_v43 = vsel %vm884_vm9, %v885_v40, %v883_v44 }
 0x78b   :  { %v888_v45 = vadd.f32 1e-06, %v886_v43 }
 0x78d   :  { %2097 = vrcp.f32 %v888_v45 }
 0x796   :  { %v2096_v52 = vpop.eup %2095 }
 0x797   :  { %v890_v53 = vmul.f32 %v2096_v52, %v871_v50 }
 0x799   :  { %v897_v55 = vadd.f32 %v896_v51, %v890_v53 }
 0x79a   :  { %v2098_v56 = vpop.eup %2097 }
 0x79b   :  { %v892_v57 = vmul.f32 %v2098_v56, %v872_v54  ;;  %1962 = vmatprep.mubr.msk.f32.mxu0 %vm114_vm0, %v897_v55 }
 0x79d   :  { %v898_v58 = vadd.f32 %v896_v51, %v892_v57 }
 0x79f   :  { %1963 = vmatmul.mubr.msk.f32.vlgmr.msra.gmra.mxu0 %vm114_vm0, %v898_v58 }
 0x85f   :  { %v1964_v47 = vpop.f32.mrf.mxu0 }
 0x860   :  { %v981_v63 = vmul.f32 %v1964_v47, %v2395_v3  ;;  %v983_v13 = vmul.f32 %v1964_v47, %v2403_v6  ;;  %v985_v14 = vmul.f32 %v1964_v47, %v2411_v8  ;;  %v987_v41 = vmul.f32 %v1964_v47, %v2419_v10 }
 0x861   :  { %v971_v2 = vpop.f32.mrf.mxu0 }
 0x862   :  { %v980_v11 = vmul.f32 %v971_v2, %v2384_v62  ;;  %v982_v12 = vmul.f32 %v971_v2, %v2401_v5  ;;  %v984_v29 = vmul.f32 %v971_v2, %v2409_v7  ;;  %v986_v18 = vmul.f32 %v971_v2, %v2417_v9 }
 0x864   :  { %1969 = vmatprep.mubr.msk.f32.mxu1 %vm114_vm0, %v980_v11 }
 0x865   :  { %1970 = vmatmul.mubr.msk.f32.vlgmr.msra.gmra.mxu1 %vm114_vm0, %v981_v63 }
 0x866   :  { %1972 = vmatprep.mubr.msk.f32.mxu1 %vm114_vm0, %v982_v12 }
 0x869   :  { %1973 = vmatmul.mubr.msk.f32.gmra.mxu1 %vm114_vm0, %v983_v13 }
 0x86a   :  { %1975 = vmatprep.mubr.msk.f32.mxu1 %vm114_vm0, %v984_v29 }
 0x86d   :  { %1976 = vmatmul.mubr.msk.f32.gmra.mxu1 %vm114_vm0, %v985_v14 }
 0x86e   :  { %1978 = vmatprep.mubr.msk.f32.mxu1 %vm114_vm0, %v986_v18 }
 0x871   :  { %1979 = vmatmul.mubr.msk.f32.gmra.mxu1 %vm114_vm0, %v987_v41 }
 0x925   :  { %v1971_v20 = vpop.f32.mrf.mxu1 }
 0x926   :  { %v1114_v1 = vadd.f32 %v1971_v20, %v991_v37 }
 0x927   :  { %v1108_v22 = vpop.f32.mrf.mxu1 }
 0x928   :  { %v1109_v0 = vadd.f32 %v1108_v22, %v989_v21  ;;  %v1150_v23 = vsel %vm510_vm5, %v1114_v1, -inf }
 0x929   :  { %1151 = vmax.xlane.f32.xlu1 %v1150_v23  ;;  %v1974_v24 = vpop.f32.mrf.mxu1 }
 0x92a   :  { %v1124_v27 = vadd.f32 %v1974_v24, %v995_v4  ;;  %v1147_v28 = vsel %vm510_vm5, %v1109_v0, -inf }
 0x92b   :  { %v1118_v31 = vpop.f32.mrf.mxu1  ;;  %1148 = vmax.xlane.f32.xlu0 %v1147_v28 }
 0x92c   :  { %v1119_v34 = vadd.f32 %v1118_v31, %v993_v19  ;;  %v1156_v36 = vsel %vm510_vm5, %v1124_v27, -inf }
 0x92d   :  { %v1977_v33 = vpop.f32.mrf.mxu1 }
 0x92e   :  { %v1134_v30 = vadd.f32 %v1977_v33, %v999_v25  ;;  %v1153_v45 = vsel %vm510_vm5, %v1119_v34, -inf }
 0x92f   :  { %v1128_v38 = vpop.f32.mrf.mxu1  ;;  %1157 = vmax.xlane.f32.xlu0 %v1156_v36 }
 0x930   :  { %v1162_v39 = vsel %vm510_vm5, %v1134_v30, -inf  ;;  %v1129_v44 = vadd.f32 %v1128_v38, %v997_v26 }
 0x931   :  { %1163 = vmax.xlane.f32.xlu1 %v1162_v39  ;;  %v1980_v40 = vpop.f32.mrf.mxu1 }
 0x932   :  { %v1144_v43 = vadd.f32 %v1980_v40, %v1003_v35  ;;  %v1159_v51 = vsel %vm510_vm5, %v1129_v44, -inf }
 0x933   :  { %v1138_v46 = vpop.f32.mrf.mxu1  ;;  %1154 = vmax.xlane.f32.xlu0 %v1153_v45 }
 0x934   :  { %v1168_v49 = vsel %vm510_vm5, %v1144_v43, -inf  ;;  %v1139_v50 = vadd.f32 %v1138_v46, %v1001_v48 }
 0x935   :  { %1169 = vmax.xlane.f32.xlu1 %v1168_v49 }
 0x936   :  { %v1165_v52 = vsel %vm510_vm5, %v1139_v50, -inf }
 0x937   :  { %1160 = vmax.xlane.f32.xlu0 %v1159_v51 }
 0x93b   :  { %1166 = vmax.xlane.f32.xlu0 %v1165_v52 }
 0x9b2   :  { %v1152_v53 = vpop.xlane.xlu1 %1151 }
 0x9b3   :  { %v1172_v54 = vsub.f32 %v1114_v1, %v1152_v53 }
 0x9b4   :  { %v1149_v55 = vpop.xlane.xlu0 %1148 }
 0x9b5   :  { %v1181_v56 = vmul.f32 1.442695, %v1172_v54  ;;  %v1171_v57 = vsub.f32 %v1109_v0, %v1149_v55 }
 0x9b7   :  { %2099 = vpow2.f32 %v1181_v56  ;;  %v1179_v58 = vmul.f32 1.442695, %v1171_v57 }
 0x9b8   :  { %v1158_v47 = vpop.xlane.xlu0 %1157 }
 0x9b9   :  { %2101 = vpow2.f32 %v1179_v58  ;;  %v1174_v2 = vsub.f32 %v1124_v27, %v1158_v47 }
 0x9ba   :  { %v1164_v11 = vpop.xlane.xlu1 %1163 }
 0x9bb   :  { %v1185_v63 = vmul.f32 1.442695, %v1174_v2  ;;  %v1176_v12 = vsub.f32 %v1134_v30, %v1164_v11 }
 0x9bc   :  { %v1155_v13 = vpop.xlane.xlu0 %1154 }
 0x9bd   :  { %2103 = vpow2.f32 %v1185_v63  ;;  %v1189_v29 = vmul.f32 1.442695, %v1176_v12  ;;  %v1173_v14 = vsub.f32 %v1119_v34, %v1155_v13 }
 0x9be   :  { %v1170_v18 = vpop.xlane.xlu1 %1169 }
 0x9bf   :  { %2105 = vpow2.f32 %v1189_v29  ;;  %v1183_v41 = vmul.f32 1.442695, %v1173_v14  ;;  %v1178_v37 = vsub.f32 %v1144_v43, %v1170_v18  ;;  %v2139_v43 = vld [vmem:[#allocation7 + $0x50] sm:$0xff] }
 0x9c0   :  { %v1161_v19 = vpop.xlane.xlu0 %1160 }
 0x9c1   :  { %2107 = vpow2.f32 %v1183_v41  ;;  %v1193_v4 = vmul.f32 1.442695, %v1178_v37  ;;  %v1175_v20 = vsub.f32 %v1129_v44, %v1161_v19 }
 0x9c3   :  { %2109 = vpow2.f32 %v1193_v4  ;;  %v1187_v21 = vmul.f32 1.442695, %v1175_v20 }
 0x9c4   :  { %v2100_v1 = vpop.eup %2099  ;;  %v1167_v22 = vpop.xlane.xlu0 %1166 }
 0x9c5   :  { %2111 = vpow2.f32 %v1187_v21  ;;  %v1177_v0 = vsub.f32 %v1139_v50, %v1167_v22  ;;  %v1198_v23 = vsel %vm510_vm5, %v2100_v1, 0.0 }
 0x9c6   :  { %v2102_v24 = vpop.eup %2101  ;;  %1199 = vadd.xlane.f32.xlu1 %v1198_v23 }
 0x9c7   :  { %v1191_v25 = vmul.f32 1.442695, %v1177_v0  ;;  %v1195_v27 = vsel %vm510_vm5, %v2102_v24, 0.0 }
 0x9c8   :  { %1196 = vadd.xlane.f32.xlu0 %v1195_v27 }
 0x9c9   :  { %2113 = vpow2.f32 %v1191_v25 }
 0x9ca   :  { %v2104_v28 = vpop.eup %2103 }
 0x9cb   :  { %v1204_v31 = vsel %vm510_vm5, %v2104_v28, 0.0 }
 0x9cc   :  { %v2106_v33 = vpop.eup %2105  ;;  %1205 = vadd.xlane.f32.xlu1 %v1204_v31 }
 0x9cd   :  { %v1210_v34 = vsel %vm510_vm5, %v2106_v33, 0.0 }
 0x9ce   :  { %v2108_v26 = vpop.eup %2107 }
 0x9cf   :  { %v1201_v30 = vsel %vm510_vm5, %v2108_v26, 0.0 }
 0x9d0   :  { %v2110_v36 = vpop.eup %2109  ;;  %1211 = vadd.xlane.f32.xlu1 %v1210_v34  ;;  %1202 = vadd.xlane.f32.xlu0 %v1201_v30 }
 0x9d1   :  { %v1216_v35 = vsel %vm510_vm5, %v2110_v36, 0.0 }
 0x9d2   :  { %v2112_v38 = vpop.eup %2111 }
 0x9d3   :  { %v1207_v39 = vsel %vm510_vm5, %v2112_v38, 0.0 }
 0x9d4   :  { %1217 = vadd.xlane.f32.xlu1 %v1216_v35  ;;  %1208 = vadd.xlane.f32.xlu0 %v1207_v39 }
 0x9d6   :  { %v2114_v40 = vpop.eup %2113 }
 0x9d7   :  { %v1213_v44 = vsel %vm510_vm5, %v2114_v40, 0.0 }
 0x9d8   :  { %1214 = vadd.xlane.f32.xlu0 %v1213_v44 }
 0x9e5   :  { %1235 = vrot.lane.b32.xlu1 %v2380_v60, %s2261_s2 }
 0x9e9   :  { %1390 = vrot.lane.b32.xlu1 %v2139_v43, %s2263_s11 }
 0x9ed   :  { %1388 = vrot.lane.b32.xlu1 %v2336_v15, %s2263_s11 }
 0x9ee   :  { %1237 = vrot.lane.b32.xlu0 %v2378_v59, %s2261_s2 }
 0x9f1   :  { %1384 = vrot.lane.b32.xlu1 %v2344_v17, %s2263_s11 }
 0x9f2   :  { %1386 = vrot.lane.b32.xlu0 %v2340_v16, %s2263_s11 }
 0xa4f   :  { %v1200_v45 = vpop.xlane.xlu1 %1199 }
 0xa51   :  { %v1197_v46 = vpop.xlane.xlu0 %1196 }
 0xa52   :  { %2115 = vrcp.f32 %v1197_v46 }
 0xa53   :  { %2117 = vrcp.f32 %v1200_v45 }
 0xa55   :  { %v1206_v48 = vpop.xlane.xlu1 %1205 }
 0xa59   :  { %v1203_v60 = vpop.xlane.xlu0 %1202  ;;  %v1212_v49 = vpop.xlane.xlu1 %1211 }
 0xa5a   :  { %2119 = vrcp.f32 %v1203_v60 }
 0xa5b   :  { %2121 = vrcp.f32 %v1206_v48 }
 0xa5d   :  { %v1209_v50 = vpop.xlane.xlu0 %1208  ;;  %v1218_v51 = vpop.xlane.xlu1 %1217 }
 0xa5e   :  { %2123 = vrcp.f32 %v1209_v50 }
 0xa5f   :  { %v2116_v15 = vpop.eup %2115  ;;  %2125 = vrcp.f32 %v1212_v49 }
 0xa60   :  { %v1220_v59 = vmul.f32 %v2116_v15, %v2102_v24  ;;  %v2118_v16 = vpop.eup %2117  ;;  %v2141_v15 = vld [vmem:[#allocation8 + $0x38] sm:$0xff] }
 0xa61   :  { %v1215_v52 = vpop.xlane.xlu0 %1214  ;;  %v1236_v53 = vpop.permute.xlu1 %1235  ;;  %v1222_v55 = vmul.f32 %v2118_v16, %v2100_v1  ;;  %v85_v16 = vld [vmem:[#allocation7 + $0x40] sm:$0xff] }
 0xa62   :  { %2127 = vrcp.f32 %v1215_v52  ;;  %1985 = vmatprep.mubr.msk.f32.mxu0 %vm510_vm5, %v1220_v59  ;;  %v2142_v59 = vld [vmem:[#allocation8 + $0x18] sm:$0xff] }
 0xa63   :  { %2129 = vrcp.f32 %v1218_v51  ;;  %v2143_v51 = vld [vmem:[#allocation8 + $0x8] sm:$0xff]  ;;  %v88_v52 = vld [vmem:[#allocation7 + $0x58] sm:$0xff] }
 0xa64   :  { %2008 = vmatprep.subr.mxu1 %v88_v52 }
 0xa65   :  { %v1238_v17 = vpop.permute.xlu0 %1237  ;;  %v1391_v18 = vpop.permute.xlu1 %1390  ;;  %2009 = vmatpush3.msra.mxu1 %v88_v52 }
 0xa66   :  { %1981 = vmatprep.subr.mxu0 %v1238_v17  ;;  %2010 = vmatprep.subr.mxu1 %v85_v16 }
 0xa67   :  { %1982 = vmatpush3.msra.mxu0 %v1238_v17  ;;  %v2120_v54 = vpop.eup %2119  ;;  %v82_v17 = vld [vmem:[#allocation7 + $0x28] sm:$0xff]  ;;  %2011 = vmatpush3.msra.mxu1 %v85_v16 }
 0xa68   :  { %1983 = vmatprep.subr.mxu0 %v1236_v53  ;;  %v2122_v56 = vpop.eup %2121  ;;  %v1224_v57 = vmul.f32 %v2120_v54, %v2108_v26  ;;  %2012 = vmatprep.subr.mxu1 %v82_v17 }
 0xa69   :  { %1984 = vmatpush3.msra.mxu0 %v1236_v53  ;;  %v1226_v47 = vmul.f32 %v2122_v56, %v2104_v28  ;;  %v1389_v41 = vpop.permute.xlu1 %1388  ;;  %v1387_v37 = vpop.permute.xlu0 %1386  ;;  %v79_v53 = vld [vmem:[#allocation7 + $0x10] sm:$0xff]  ;;  %2013 = vmatpush3.msra.mxu1 %v82_v17 }
 0xa6a   :  { %1986 = vmatmul.mubr.msk.f32.vlgmr.msra.gmra.mxu0 %vm510_vm5, %v1222_v55  ;;  %1997 = vmatprep.subr.mxu0 %v1391_v18 }
 0xa6b   :  { %1988 = vmatprep.mubr.msk.f32.mxu0 %vm510_vm5, %v1224_v57  ;;  %v2124_v58 = vpop.eup %2123  ;;  %1998 = vmatpush3.msra.mxu0 %v1391_v18 }
 0xa6c   :  { %v2126_v2 = vpop.eup %2125  ;;  %v1228_v11 = vmul.f32 %v2124_v58, %v2112_v38  ;;  %1999 = vmatprep.subr.mxu0 %v1389_v41  ;;  %2014 = vmatprep.subr.mxu1 %v79_v53 }
 0xa6d   :  { %v1230_v12 = vmul.f32 %v2126_v2, %v2106_v33  ;;  %2000 = vmatpush3.msra.mxu0 %v1389_v41  ;;  %v1385_v19 = vpop.permute.xlu1 %1384  ;;  %2015 = vmatpush3.msra.mxu1 %v79_v53 }
 0xa6e   :  { %1989 = vmatmul.mubr.msk.f32.gmra.mxu0 %vm510_vm5, %v1226_v47  ;;  %2001 = vmatprep.subr.mxu0 %v1387_v37 }
 0xa6f   :  { %v2128_v63 = vpop.eup %2127  ;;  %1991 = vmatprep.mubr.msk.f32.mxu0 %vm510_vm5, %v1228_v11  ;;  %2002 = vmatpush3.msra.mxu0 %v1387_v37 }
 0xa70   :  { %v1232_v13 = vmul.f32 %v2128_v63, %v2114_v40  ;;  %v2130_v29 = vpop.eup %2129  ;;  %2003 = vmatprep.subr.mxu0 %v1385_v19 }
 0xa71   :  { %v1234_v14 = vmul.f32 %v2130_v29, %v2110_v36  ;;  %2004 = vmatpush3.msra.mxu0 %v1385_v19 }
 0xa72   :  { %1992 = vmatmul.mubr.msk.f32.gmra.mxu0 %vm510_vm5, %v1230_v12 }
 0xa73   :  { %1994 = vmatprep.mubr.msk.f32.mxu0 %vm510_vm5, %v1232_v13 }
 0xa76   :  { %1995 = vmatmul.mubr.msk.f32.gmra.mxu0 %vm510_vm5, %v1234_v14 }
 0xb2a   :  { %v1987_v4 = vpop.f32.mrf.mxu0 }
 0xb2b   :  { %v1371_v28 = vmul.f32 %v1987_v4, %v2395_v3 }
 0xb2c   :  { %v1331_v20 = vpop.f32.mrf.mxu0 }
 0xb2d   :  { %v1370_v25 = vmul.f32 %v1331_v20, %v2384_v62 }
 0xb2e   :  { %v1990_v21 = vpop.f32.mrf.mxu0 }
 0xb2f   :  { %v1373_v23 = vmul.f32 %v1990_v21, %v2403_v6 }
 0xb30   :  { %v1341_v1 = vpop.f32.mrf.mxu0 }
 0xb31   :  { %v1372_v0 = vmul.f32 %v1341_v1, %v2401_v5  ;;  %v1379_v34 = vadd.f32 %v1373_v23, %v1371_v28  ;;  %v2144_v23 = vld [vmem:[#allocation8 + $0x40] sm:$0xff] }
 0xb32   :  { %v1993_v22 = vpop.f32.mrf.mxu0 }
 0xb33   :  { %v1375_v31 = vmul.f32 %v1993_v22, %v2411_v8  ;;  %v1378_v26 = vadd.f32 %v1372_v0, %v1370_v25  ;;  %v1501_v22 = vsub.s32 6, %v2362_v42  ;;  %v1527_v0 = vsub.s32 7, %v2362_v42 }
 0xb34   :  { %v1351_v24 = vpop.f32.mrf.mxu0 }
 0xb35   :  { %v1374_v27 = vmul.f32 %v1351_v24, %v2409_v7  ;;  %v1381_v39 = vadd.f32 %v1379_v34, %v1375_v31  ;;  %v1502_v24 = vrot.slane %v2144_v23, %v1501_v22 }
 0xb36   :  { %v1996_v33 = vpop.f32.mrf.mxu0 }
 0xb37   :  { %v1377_v30 = vmul.f32 %v1996_v33, %v2419_v10  ;;  %v1380_v38 = vadd.f32 %v1378_v26, %v1374_v27  ;;  %v1528_v27 = vrot.slane %v2144_v23, %v1527_v0 }
 0xb38   :  { %v1361_v36 = vpop.f32.mrf.mxu0 }
 0xb39   :  { %v1376_v35 = vmul.f32 %v1361_v36, %v2417_v9  ;;  %v1383_v40 = vadd.f32 %v1381_v39, %v1377_v30 }
 0xb3b   :  { %v1382_v6 = vadd.f32 %v1380_v38, %v1376_v35 }
 0xb3d   :  { %2005 = vmatprep.mubr.msk.f32.mxu0 %vm114_vm0, %v1382_v6  ;;  %v1533_v6 = vsub.s32 0, %v2362_v42 }
 0xb3e   :  { %2006 = vmatmul.mubr.msk.f32.vlgmr.msra.gmra.mxu0 %vm114_vm0, %v1383_v40 }
 0xb3f   :  { %v1534_v40 = vrot.slane %v2144_v23, %v1533_v6 }
 0xbfe   :  { %v2007_v62 = vpop.f32.mrf.mxu0 }
 0xbff   :  { %v2618_v3 = vadd.f32 %v2007_v62, %v2529_v32  ;;  %v2140_v32 = vld [vmem:[#allocation8] sm:$0xff] }
 0xc00   :  { %v1468_v44 = vpop.f32.mrf.mxu0 }
 0xc01   :  { %v2621_v43 = vadd.f32 %v1468_v44, %v2532_v61  ;;  %v1482_v10 = vsel %vm114_vm0, %v2618_v3, 0.0 }
 0xc02   :  { %1483 = vadd.xlane.f32.xlu1 %v1482_v10 }
 0xc03   :  { %v1479_v45 = vsel %vm114_vm0, %v2621_v43, 0.0 }
 0xc04   :  { %1480 = vadd.xlane.f32.xlu0 %v1479_v45 }
 0xc13   :  { %1630 = vrot.lane.b32.xlu1 %v2417_v9, %s2261_s2 }
 0xc17   :  { %1628 = vrot.lane.b32.xlu1 %v2411_v8, %s2261_s2 }
 0xc1b   :  { %1626 = vrot.lane.b32.xlu1 %v2409_v7, %s2261_s2 }
 0xc1f   :  { %1622 = vrot.lane.b32.xlu1 %v2401_v5, %s2261_s2 }
 0xc23   :  { %1618 = vrot.lane.b32.xlu1 %v2140_v32, %s2261_s2 }
 0xc8b   :  { %v1484_v61 = vpop.xlane.xlu1 %1483 }
 0xc8c   :  { %v1486_v46 = vmul.f32 0.03125, %v1484_v61 }
 0xc8d   :  { %v1481_v48 = vpop.xlane.xlu0 %1480 }
 0xc8e   :  { %v1485_v60 = vmul.f32 0.03125, %v1481_v48  ;;  %v2637_v49 = vsub.f32 %v2618_v3, %v1486_v46  ;;  %v1728_v46 = vsub.s32 1, %v2362_v42 }
 0xc8f   :  { %v1631_v55 = vpop.permute.xlu1 %1630 }
 0xc90   :  { %v2640_v9 = vsub.f32 %v2621_v43, %v1485_v60  ;;  %v1490_v5 = vmul.f32 %v2637_v49, %v2637_v49  ;;  %v1504_v33 = vmul.f32 %v1502_v24, %v2637_v49  ;;  %v1729_v48 = vrot.slane %v2144_v23, %v1728_v46 }
 0xc92   :  { %v1489_v8 = vmul.f32 %v2640_v9, %v2640_v9  ;;  %v1494_v50 = vsel %vm114_vm0, %v1490_v5, 0.0  ;;  %v1503_v25 = vmul.f32 %v1502_v24, %v2640_v9 }
 0xc93   :  { %v1629_v47 = vpop.permute.xlu1 %1628 }
 0xc94   :  { %v1491_v7 = vsel %vm114_vm0, %v1489_v8, 0.0 }
 0xc95   :  { %1492 = vadd.xlane.f32.xlu0 %v1491_v7 }
 0xc97   :  { %v1627_v11 = vpop.permute.xlu1 %1626 }
 0xc99   :  { %1495 = vadd.xlane.f32.xlu0 %v1494_v50 }
 0xc9b   :  { %v1623_v38 = vpop.permute.xlu1 %1622 }
 0xc9f   :  { %v1619_v39 = vpop.permute.xlu1 %1618 }
 0xcaf   :  { %1632 = vrot.lane.b32.xlu0 %v2141_v15, %s2261_s2 }
 0xcb3   :  { %1624 = vrot.lane.b32.xlu0 %v2142_v59, %s2261_s2 }
 0xcb7   :  { %1620 = vrot.lane.b32.xlu0 %v2143_v51, %s2261_s2 }
 0xd1e   :  { %v1493_v54 = vpop.xlane.xlu0 %1492 }
 0xd1f   :  { %v1497_v56 = vmul.f32 0.032258064, %v1493_v54 }
 0xd21   :  { %2131 = vrsqrt.f32 %v1497_v56  ;;  %vm1507_vm10 = vcmp.eq.f32.partialorder %v1497_v56, inf  ;;  %v1510_v29 = vand.u32 2147483648, %v1497_v56  ;;  %vm1509_vm11 = vcmp.eq.f32.partialorder %v1497_v56, 0.0 }
 0xd22   :  { %v1496_v57 = vpop.xlane.xlu0 %1495 }
 0xd23   :  { %v1498_v58 = vmul.f32 0.032258064, %v1496_v57 }
 0xd25   :  { %2133 = vrsqrt.f32 %v1498_v58  ;;  %vm1514_vm12 = vcmp.eq.f32.partialorder %v1498_v58, inf  ;;  %v1517_v4 = vand.u32 2147483648, %v1498_v58  ;;  %vm1516_vm13 = vcmp.eq.f32.partialorder %v1498_v58, 0.0 }
 0xd26   :  { %v1633_v2 = vpop.permute.xlu0 %1632 }
 0xd27   :  { %2019 = vmatprep.subr.mxu0 %v1633_v2 }
 0xd28   :  { %2020 = vmatpush3.msra.mxu0 %v1633_v2 }
 0xd29   :  { %2021 = vmatprep.subr.mxu0 %v1631_v55 }
 0xd2a   :  { %2022 = vmatpush3.msra.mxu0 %v1631_v55  ;;  %v1625_v63 = vpop.permute.xlu0 %1624 }
 0xd2b   :  { %2023 = vmatprep.subr.mxu0 %v1629_v47 }
 0xd2c   :  { %2024 = vmatpush3.msra.mxu0 %v1629_v47 }
 0xd2d   :  { %2025 = vmatprep.subr.mxu0 %v1627_v11 }
 0xd2e   :  { %v2132_v12 = vpop.eup %2131  ;;  %2026 = vmatpush3.msra.mxu0 %v1627_v11  ;;  %v1621_v35 = vpop.permute.xlu0 %1620 }
 0xd2f   :  { %v1506_v13 = vmul.f32 %v2132_v12, %v1497_v56  ;;  %2027 = vmatprep.subr.mxu0 %v1625_v63 }
 0xd30   :  { %2028 = vmatpush3.msra.mxu0 %v1625_v63 }
 0xd31   :  { %v1508_v14 = vsel %vm1507_vm10, %v1497_v56, %v1506_v13  ;;  %2029 = vmatprep.subr.mxu0 %v1623_v38 }
 0xd32   :  { %v2134_v18 = vpop.eup %2133  ;;  %v1511_v41 = vsel %vm1509_vm11, %v1510_v29, %v1508_v14  ;;  %2030 = vmatpush3.msra.mxu0 %v1623_v38 }
 0xd33   :  { %v1519_v37 = vadd.f32 1e-06, %v1511_v41  ;;  %v1513_v19 = vmul.f32 %v2134_v18, %v1498_v58  ;;  %2031 = vmatprep.subr.mxu0 %v1621_v35 }
 0xd34   :  { %2032 = vmatpush3.msra.mxu0 %v1621_v35 }
 0xd35   :  { %2135 = vrcp.f32 %v1519_v37  ;;  %v1515_v20 = vsel %vm1514_vm12, %v1498_v58, %v1513_v19  ;;  %2033 = vmatprep.subr.mxu0 %v1619_v39 }
 0xd36   :  { %v1518_v21 = vsel %vm1516_vm13, %v1517_v4, %v1515_v20  ;;  %2034 = vmatpush3.msra.mxu0 %v1619_v39 }
 0xd37   :  { %v1520_v1 = vadd.f32 1e-06, %v1518_v21 }
 0xd39   :  { %2137 = vrcp.f32 %v1520_v1 }
 0xd42   :  { %v2136_v28 = vpop.eup %2135 }
 0xd43   :  { %v1522_v31 = vmul.f32 %v2136_v28, %v1503_v25 }
 0xd45   :  { %v1529_v26 = vadd.f32 %v1528_v27, %v1522_v31 }
 0xd46   :  { %v2138_v34 = vpop.eup %2137 }
 0xd47   :  { %v1524_v30 = vmul.f32 %v2138_v34, %v1504_v33  ;;  %2016 = vmatprep.mubr.msk.f32.mxu1 %vm114_vm0, %v1529_v26 }
 0xd49   :  { %v1530_v36 = vadd.f32 %v1528_v27, %v1524_v30 }
 0xd4b   :  { %2017 = vmatmul.mubr.msk.f32.vlgmr.msra.gmra.mxu1 %vm114_vm0, %v1530_v36 }
 0xe0b   :  { %v2018_v62 = vpop.f32.mrf.mxu1 }
 0xe0c   :  { %v1613_v44 = vadd.f32 %v2018_v62, %v1534_v40 }
 0xe0d   :  { %v1607_v10 = vpop.f32.mrf.mxu1 }
 0xe0e   :  { %v1608_v45 = vadd.f32 %v1607_v10, %v1534_v40  ;;  %v1617_v61 = vmax.f32 %v1613_v44, 0.0 }
 0xe10   :  { %v1616_v32 = vmax.f32 %v1608_v45, 0.0 }
 0xe12   :  { %2035 = vmatprep.mubr.msk.f32.mxu0 %vm1642_vm14, %v1616_v32 }
 0xe13   :  { %2036 = vmatmul.mubr.msk.f32.vlgmr.msra.gmra.mxu0 %vm1642_vm14, %v1617_v61 }
 0xed3   :  { %v2037_v60 = vpop.f32.mrf.mxu0 }
 0xed4   :  { %v1725_v49 = vadd.f32 %v2037_v60, %v2618_v3 }
 0xed5   :  { %v1715_v9 = vpop.f32.mrf.mxu0 }
 0xed6   :  { %v1731_v8 = vadd.f32 %v1729_v48, %v1725_v49  ;;  %v1724_v7 = vadd.f32 %v1715_v9, %v2621_v43 }
 0xed8   :  { %1733 = vst.msk [vmem:[#allocation10 + $0x8] sm:$0xff] %vm114_vm0, %v1731_v8  ;;  %v1730_v5 = vadd.f32 %v1729_v48, %v1724_v7 }
 0xeda   :  { %1732 = vst.msk [vmem:[#allocation10] sm:$0xff] %vm114_vm0, %v1730_v5 }
 0xedb   :  { %2236 = shalt.err (!%p2233_p10)
}
 0xedc   :  { %1745 = dma.vmem_to_hbm [thread:$0]  %s1740_s14, 256, %s2673_s4, [#allocation4], %s2255_s20, %s2255_s20, %s2256_s21  }
 0xedd   :  { %2251 = dma.done.wait [#allocation4], 256  }
 0xede   :  { %2252 = vsyncadd [#allocation4], 4294967040 }
 0xedf   :  { %1749 = vsyncpa [#allocation3], 1 }
 0xee0   :  { %1750 = vsyncpa [#allocation6], 1 }
 0xee1   :  { %1751 = vsyncpa [#allocation9], 1 }
 0xee2   :  { %1752 = vsyncpa [#allocation4], 1 }

</bundles_post_ra>
